<compile_context>
chip_gen: v7x
topology: tpu7x:2x2x1
jax: 0.10.0
libtpu: 0.0.40
codegen_flags: <defaults>
</compile_context>

<pallas_src>
import functools

import jax
import jax.numpy as jnp
from jax.experimental import pallas as pl
from jax.experimental.pallas import tpu as pltpu

_SQRT_2_OVER_PI = 0.7978845608028654


def _gelu(x):
    # tanh-approximate GELU, computed in f32.
    return 0.5 * x * (1.0 + jnp.tanh(_SQRT_2_OVER_PI * (x + 0.044715 * (x * x * x))))


def _residual_mlp_kernel(*refs, block_has_adjust):
    """Fused ResidualMLP forward for one batch tile.

    refs layout: [x, w0, b0, (w1, b1, w2, b2[, wa, ba]) per residual block, wf, bf, out].
    Weights are (in_features, out_features) bf16; biases are (1, out_features) f32.
    """
    it = iter(refs[:-1])
    o_ref = refs[-1]

    def dot_bf16(a, w_ref):
        # MXU-native path: bf16 operands, f32 accumulation.
        return jnp.dot(a.astype(jnp.bfloat16), w_ref[...],
                       preferred_element_type=jnp.float32)

    x_ref = next(it)

    # Flatten -> Linear(input_size, layers[0]); no activation between them in the module.
    w0, b0 = next(it), next(it)
    h = dot_bf16(x_ref[...], w0) + b0[...]                              # (TB, L0_p) f32

    # MLP_Block_Residual: y = act(lin1(h)); y = lin2(y); id = adjust(h) if needed; h = act(y+id)
    for has_adjust in block_has_adjust:
        w1, b1, w2, b2 = next(it), next(it), next(it), next(it)
        identity = h
        y = _gelu(dot_bf16(h, w1) + b1[...])
        y = dot_bf16(y, w2) + b2[...]
        if has_adjust:
            wa, ba = next(it), next(it)
            identity = dot_bf16(identity, wa) + ba[...]
        h = _gelu(y + identity)

    # Final classifier Linear (output dim zero-padded to a lane-dense multiple of 128).
    wf, bf = next(it), next(it)
    o_ref[...] = (dot_bf16(h, wf) + bf[...]).astype(o_ref.dtype)


def _round_up(x, m):
    return (x + m - 1) // m * m


def _pad2d(a, rows, cols, dtype):
    """Cast + zero-pad a 2-D array to (rows, cols). Zeros are exact through the network."""
    a = a.astype(dtype)
    if a.shape == (rows, cols):
        return a
    return jnp.zeros((rows, cols), dtype).at[: a.shape[0], : a.shape[1]].set(a)


def _const_block_spec(shape):
    """Weight/bias block: constant index_map, single-buffered (it never changes)."""
    try:
        return pl.BlockSpec(shape, lambda i: (0, 0), pipeline_mode=pl.Buffered(1))
    except Exception:  # older jax without pipeline_mode / Buffered: fall back to default
        return pl.BlockSpec(shape, lambda i: (0, 0))


def residual_mlp_forward(x_nchw, params, *, max_batch_tile=512):
    """Forward pass of ResidualMLP.

    x_nchw: (N, C, H, W).
    params: {"w0","b0", "blocks": [{"w1","b1","w2","b2"[, "wa","ba"]}...], "wf","bf"},
            weights stored (in_features, out_features) (= torch Linear weight.T),
            biases (out_features,).  All f32; padding/bf16 cast happens here.
    """
    N = x_nchw.shape[0]
    x = x_nchw.reshape(N, -1)                        # nn.Flatten()
    din = x.shape[1]
    out_dtype = x_nchw.dtype

    # ----- padded (lane-dense) widths -------------------------------------------------------
    din_p = _round_up(din, 128)
    widths = [params["w0"].shape[1]] + [blk["w1"].shape[1] for blk in params["blocks"]]
    widths_p = [_round_up(w, 128) for w in widths]
    num_classes = params["wf"].shape[1]
    ncls_p = _round_up(num_classes, 128)

    # ----- batch tiling: multiple of 16 (bf16 sublanes); >=2 grid steps when batch allows ----
    tb = min(_round_up(N, 16), max_batch_tile)
    if N > 16 and _round_up(N, tb) // tb < 2:
        tb = _round_up((N + 1) // 2, 16)             # lets the "parallel" axis use both v7x TCs
    n_p = _round_up(N, tb)

    # ----- weights / biases: zero-pad every dim to 128, weights -> bf16, biases stay f32 -----
    wdt, bdt = jnp.bfloat16, jnp.float32
    flat_inputs = [None]                             # slot 0 = x, filled below
    flat_inputs += [_pad2d(params["w0"], din_p, widths_p[0], wdt),
                    _pad2d(params["b0"].reshape(1, -1), 1, widths_p[0], bdt)]
    block_has_adjust = []
    prev_p = widths_p[0]
    for i, blk in enumerate(params["blocks"]):
        cur_p = widths_p[i + 1]
        flat_inputs += [_pad2d(blk["w1"], prev_p, cur_p, wdt),
                        _pad2d(blk["b1"].reshape(1, -1), 1, cur_p, bdt),
                        _pad2d(blk["w2"], cur_p, cur_p, wdt),
                        _pad2d(blk["b2"].reshape(1, -1), 1, cur_p, bdt)]
        has_adj = "wa" in blk
        if has_adj:
            flat_inputs += [_pad2d(blk["wa"], prev_p, cur_p, wdt),
                            _pad2d(blk["ba"].reshape(1, -1), 1, cur_p, bdt)]
        block_has_adjust.append(has_adj)
        prev_p = cur_p
    flat_inputs += [_pad2d(params["wf"], prev_p, ncls_p, wdt),
                    _pad2d(params["bf"].reshape(1, -1), 1, ncls_p, bdt)]

    # ----- x: skip the padded copy when already aligned; fold bf16 cast into the pad copy ----
    if din == din_p and N == n_p:
        x_in = x                                      # no extra HBM pass; kernel casts per-tile
    else:
        x_in = jnp.zeros((n_p, din_p), jnp.bfloat16).at[:N, :din].set(x.astype(jnp.bfloat16))
    flat_inputs[0] = x_in

    # ----- BlockSpecs: x/out tiled over batch (double-buffered), weights resident (1 buffer) --
    in_specs = [pl.BlockSpec((tb, din_p), lambda i: (i, 0))]
    in_specs += [_const_block_spec(a.shape) for a in flat_inputs[1:]]
    out_spec = pl.BlockSpec((tb, ncls_p), lambda i: (i, 0))

    # ----- explicit VMEM budget ---------------------------------------------------------------
    nbytes = lambda a: a.size * jnp.dtype(a.dtype).itemsize
    weight_bytes = sum(nbytes(a) for a in flat_inputs[1:])              # resident, 1 buffer
    io_bytes = 2 * tb * (din_p * jnp.dtype(x_in.dtype).itemsize
                         + ncls_p * jnp.dtype(out_dtype).itemsize)      # double-buffered x/out
    wmax = max([din_p, ncls_p] + widths_p)
    interm_bytes = 6 * tb * wmax * 4                                    # f32 h/y/identity temps
    vmem_limit = int(min(max(weight_bytes + io_bytes + interm_bytes + (4 << 20), 32 << 20),
                         100 << 20))

    kernel = functools.partial(_residual_mlp_kernel,
                               block_has_adjust=tuple(block_has_adjust))
    out_p = pl.pallas_call(
        kernel,
        out_shape=jax.ShapeDtypeStruct((n_p, ncls_p), out_dtype),
        grid_spec=pltpu.PrefetchScalarGridSpec(
            num_scalar_prefetch=0,
            grid=(n_p // tb,),
            in_specs=in_specs,
            out_specs=out_spec,
        ),
        compiler_params=pltpu.CompilerParams(
            dimension_semantics=("parallel",),
            vmem_limit_bytes=vmem_limit),
    )(*flat_inputs)

    return out_p[:N, :num_classes]


# ---------------------------------- pure-JAX references ---------------------------------------
def _ref_forward_f32(x_nchw, params):
    # Module semantics (same tanh-GELU), all f32.
    h = x_nchw.reshape(x_nchw.shape[0], -1)
    h = h @ params["w0"] + params["b0"]
    for blk in params["blocks"]:
        identity = h
        y = _gelu(h @ blk["w1"] + blk["b1"])
        y = y @ blk["w2"] + blk["b2"]
        if "wa" in blk:
            identity = identity @ blk["wa"] + blk["ba"]
        h = _gelu(y + identity)
    return h @ params["wf"] + params["bf"]


def _ref_forward_bf16(x_nchw, params):
    # Mirrors the kernel numerics: bf16 matmul operands, f32 accumulation / elementwise.
    def d(a, w):
        return jnp.dot(a.astype(jnp.bfloat16), w.astype(jnp.bfloat16),
                       preferred_element_type=jnp.float32)
    h = x_nchw.reshape(x_nchw.shape[0], -1)
    h = d(h, params["w0"]) + params["b0"]
    for blk in params["blocks"]:
        identity = h
        y = _gelu(d(h, blk["w1"]) + blk["b1"])
        y = d(y, blk["w2"]) + blk["b2"]
        if "wa" in blk:
            identity = d(identity, blk["wa"]) + blk["ba"]
        h = _gelu(y + identity)
    return d(h, params["wf"]) + params["bf"]


def _linear_params(key, fan_in, fan_out):
    kw, kb = jax.random.split(key)
    # Stored as (in, out) == transpose of the torch nn.Linear weight; same init scale as torch.
    bound = 1.0 / jnp.sqrt(fan_in)
    w = jax.random.uniform(kw, (fan_in, fan_out), jnp.float32, -bound, bound)
    b = jax.random.uniform(kb, (fan_out,), jnp.float32, -bound, bound)
    return w, b


if __name__ == "__main__":
    # Small config consistent with the module. input_shape=(3,8,8) -> input_size=192 (exercises
    # feature-dim padding); layers=(256,256,96): block1 256->256 (identity path), block2 256->96
    # (adjust_dimensions path, non-128-aligned width -> exercises hidden padding).
    N = 2
    input_shape = (3, 8, 8)
    layers = (256, 256, 96)
    num_classes = 10

    input_size = input_shape[0] * input_shape[1] * input_shape[2]
    n_blocks = len(layers) - 1

    key = jax.random.PRNGKey(0)
    k_x, k0, kf, *k_blocks = jax.random.split(key, 3 + n_blocks)

    x = jax.random.normal(k_x, (N,) + input_shape, jnp.float32)

    params = {"blocks": []}
    params["w0"], params["b0"] = _linear_params(k0, input_size, layers[0])
    for i in range(1, len(layers)):
        k1, k2, ka = jax.random.split(k_blocks[i - 1], 3)
        blk = {}
        blk["w1"], blk["b1"] = _linear_params(k1, layers[i - 1], layers[i])
        blk["w2"], blk["b2"] = _linear_params(k2, layers[i], layers[i])
        if layers[i - 1] != layers[i]:
            blk["wa"], blk["ba"] = _linear_params(ka, layers[i - 1], layers[i])
        params["blocks"].append(blk)
    params["wf"], params["bf"] = _linear_params(kf, layers[-1], num_classes)

    out = jax.block_until_ready(residual_mlp_forward(x, params))
    assert out.shape == (N, num_classes)

    # Tight check vs a reference using the kernel's exact numerics (bf16 operands, f32 accum).
    err_bf16 = float(jnp.max(jnp.abs(out - _ref_forward_bf16(x, params))))
    assert err_bf16 < 5e-3, f"bf16-matched ref mismatch: {err_bf16}"
    # Loose check vs full-f32 module semantics (bf16 operand quantization ~1e-2 relative).
    err_f32 = float(jnp.max(jnp.abs(out - _ref_forward_f32(x, params))))
    assert err_f32 < 5e-2, f"f32 ref mismatch: {err_f32}"

    print("KERNEL_OK")
</pallas_src>

<mosaic_0001>
module attributes {stable_mosaic.version = 11 : i64} {
  func.func @_residual_mlp_kernel(%arg0: i32, %arg1: memref<16x256xbf16, #tpu.memory_space<vmem>>, %arg2: memref<256x256xbf16, #tpu.memory_space<vmem>>, %arg3: memref<1x256xf32, #tpu.memory_space<vmem>>, %arg4: memref<256x256xbf16, #tpu.memory_space<vmem>>, %arg5: memref<1x256xf32, #tpu.memory_space<vmem>>, %arg6: memref<256x256xbf16, #tpu.memory_space<vmem>>, %arg7: memref<1x256xf32, #tpu.memory_space<vmem>>, %arg8: memref<256x128xbf16, #tpu.memory_space<vmem>>, %arg9: memref<1x128xf32, #tpu.memory_space<vmem>>, %arg10: memref<128x128xbf16, #tpu.memory_space<vmem>>, %arg11: memref<1x128xf32, #tpu.memory_space<vmem>>, %arg12: memref<256x128xbf16, #tpu.memory_space<vmem>>, %arg13: memref<1x128xf32, #tpu.memory_space<vmem>>, %arg14: memref<128x128xbf16, #tpu.memory_space<vmem>>, %arg15: memref<1x128xf32, #tpu.memory_space<vmem>>, %arg16: memref<16x128xf32, #tpu.memory_space<vmem>>) attributes {dimension_semantics = [#tpu.dimension_semantics<parallel>], iteration_bounds = array<i64: 1>, scalar_prefetch = 0 : i64, scratch_operands = 0 : i64, tpu.core_type = #tpu.core_type<tc>, window_params = [{transform_indices = @transform_0, window_bounds = array<i64: 16, 256>}, {pipeline_mode = #tpu.pipeline_mode<synchronous>, transform_indices = @transform_1, window_bounds = array<i64: 256, 256>}, {pipeline_mode = #tpu.pipeline_mode<synchronous>, transform_indices = @transform_2, window_bounds = array<i64: 1, 256>}, {pipeline_mode = #tpu.pipeline_mode<synchronous>, transform_indices = @transform_3, window_bounds = array<i64: 256, 256>}, {pipeline_mode = #tpu.pipeline_mode<synchronous>, transform_indices = @transform_4, window_bounds = array<i64: 1, 256>}, {pipeline_mode = #tpu.pipeline_mode<synchronous>, transform_indices = @transform_5, window_bounds = array<i64: 256, 256>}, {pipeline_mode = #tpu.pipeline_mode<synchronous>, transform_indices = @transform_6, window_bounds = array<i64: 1, 256>}, {pipeline_mode = #tpu.pipeline_mode<synchronous>, transform_indices = @transform_7, window_bounds = array<i64: 256, 128>}, {pipeline_mode = #tpu.pipeline_mode<synchronous>, transform_indices = @transform_8, window_bounds = array<i64: 1, 128>}, {pipeline_mode = #tpu.pipeline_mode<synchronous>, transform_indices = @transform_9, window_bounds = array<i64: 128, 128>}, {pipeline_mode = #tpu.pipeline_mode<synchronous>, transform_indices = @transform_10, window_bounds = array<i64: 1, 128>}, {pipeline_mode = #tpu.pipeline_mode<synchronous>, transform_indices = @transform_11, window_bounds = array<i64: 256, 128>}, {pipeline_mode = #tpu.pipeline_mode<synchronous>, transform_indices = @transform_12, window_bounds = array<i64: 1, 128>}, {pipeline_mode = #tpu.pipeline_mode<synchronous>, transform_indices = @transform_13, window_bounds = array<i64: 128, 128>}, {pipeline_mode = #tpu.pipeline_mode<synchronous>, transform_indices = @transform_14, window_bounds = array<i64: 1, 128>}, {transform_indices = @transform_15, window_bounds = array<i64: 16, 128>}]} {
    %c0 = arith.constant 0 : index
    %c0_0 = arith.constant 0 : index
    %0 = vector.load %arg1[%c0, %c0_0] : memref<16x256xbf16, #tpu.memory_space<vmem>>, vector<16x256xbf16>
    %c0_1 = arith.constant 0 : index
    %c0_2 = arith.constant 0 : index
    %1 = vector.load %arg2[%c0_1, %c0_2] : memref<256x256xbf16, #tpu.memory_space<vmem>>, vector<256x256xbf16>
    %cst = arith.constant dense<0.000000e+00> : vector<16x256xf32>
    %2 = tpu.matmul %0, %1, %cst {dimension_numbers = #tpu.dot_dimension_numbers<[1], [0], [0], [1], [0, 0, 1, 1], [], []>} : vector<16x256xbf16>, vector<256x256xbf16>, vector<16x256xf32> -> vector<16x256xf32>
    %c0_3 = arith.constant 0 : index
    %c0_4 = arith.constant 0 : index
    %3 = vector.load %arg3[%c0_3, %c0_4] : memref<1x256xf32, #tpu.memory_space<vmem>>, vector<1x256xf32>
    %4 = vector.broadcast %3 : vector<1x256xf32> to vector<16x256xf32>
    %5 = arith.addf %2, %4 : vector<16x256xf32>
    %6 = arith.truncf %5 : vector<16x256xf32> to vector<16x256xbf16>
    %c0_5 = arith.constant 0 : index
    %c0_6 = arith.constant 0 : index
    %7 = vector.load %arg4[%c0_5, %c0_6] : memref<256x256xbf16, #tpu.memory_space<vmem>>, vector<256x256xbf16>
    %cst_7 = arith.constant dense<0.000000e+00> : vector<16x256xf32>
    %8 = tpu.matmul %6, %7, %cst_7 {dimension_numbers = #tpu.dot_dimension_numbers<[1], [0], [0], [1], [0, 0, 1, 1], [], []>} : vector<16x256xbf16>, vector<256x256xbf16>, vector<16x256xf32> -> vector<16x256xf32>
    %c0_8 = arith.constant 0 : index
    %c0_9 = arith.constant 0 : index
    %9 = vector.load %arg5[%c0_8, %c0_9] : memref<1x256xf32, #tpu.memory_space<vmem>>, vector<1x256xf32>
    %10 = vector.broadcast %9 : vector<1x256xf32> to vector<16x256xf32>
    %11 = arith.addf %8, %10 : vector<16x256xf32>
    %cst_10 = arith.constant 5.000000e-01 : f32
    %12 = vector.broadcast %cst_10 : f32 to vector<16x256xf32>
    %13 = arith.mulf %12, %11 : vector<16x256xf32>
    %14 = arith.mulf %11, %11 : vector<16x256xf32>
    %15 = arith.mulf %14, %11 : vector<16x256xf32>
    %cst_11 = arith.constant 4.471500e-02 : f32
    %16 = vector.broadcast %cst_11 : f32 to vector<16x256xf32>
    %17 = arith.mulf %16, %15 : vector<16x256xf32>
    %18 = arith.addf %11, %17 : vector<16x256xf32>
    %cst_12 = arith.constant 0.797884583 : f32
    %19 = vector.broadcast %cst_12 : f32 to vector<16x256xf32>
    %20 = arith.mulf %19, %18 : vector<16x256xf32>
    %21 = math.tanh %20 : vector<16x256xf32>
    %cst_13 = arith.constant 1.000000e+00 : f32
    %22 = vector.broadcast %cst_13 : f32 to vector<16x256xf32>
    %23 = arith.addf %22, %21 : vector<16x256xf32>
    %24 = arith.mulf %13, %23 : vector<16x256xf32>
    %25 = arith.truncf %24 : vector<16x256xf32> to vector<16x256xbf16>
    %c0_14 = arith.constant 0 : index
    %c0_15 = arith.constant 0 : index
    %26 = vector.load %arg6[%c0_14, %c0_15] : memref<256x256xbf16, #tpu.memory_space<vmem>>, vector<256x256xbf16>
    %cst_16 = arith.constant dense<0.000000e+00> : vector<16x256xf32>
    %27 = tpu.matmul %25, %26, %cst_16 {dimension_numbers = #tpu.dot_dimension_numbers<[1], [0], [0], [1], [0, 0, 1, 1], [], []>} : vector<16x256xbf16>, vector<256x256xbf16>, vector<16x256xf32> -> vector<16x256xf32>
    %c0_17 = arith.constant 0 : index
    %c0_18 = arith.constant 0 : index
    %28 = vector.load %arg7[%c0_17, %c0_18] : memref<1x256xf32, #tpu.memory_space<vmem>>, vector<1x256xf32>
    %29 = vector.broadcast %28 : vector<1x256xf32> to vector<16x256xf32>
    %30 = arith.addf %27, %29 : vector<16x256xf32>
    %31 = arith.addf %30, %5 : vector<16x256xf32>
    %cst_19 = arith.constant 5.000000e-01 : f32
    %32 = vector.broadcast %cst_19 : f32 to vector<16x256xf32>
    %33 = arith.mulf %32, %31 : vector<16x256xf32>
    %34 = arith.mulf %31, %31 : vector<16x256xf32>
    %35 = arith.mulf %34, %31 : vector<16x256xf32>
    %cst_20 = arith.constant 4.471500e-02 : f32
    %36 = vector.broadcast %cst_20 : f32 to vector<16x256xf32>
    %37 = arith.mulf %36, %35 : vector<16x256xf32>
    %38 = arith.addf %31, %37 : vector<16x256xf32>
    %cst_21 = arith.constant 0.797884583 : f32
    %39 = vector.broadcast %cst_21 : f32 to vector<16x256xf32>
    %40 = arith.mulf %39, %38 : vector<16x256xf32>
    %41 = math.tanh %40 : vector<16x256xf32>
    %cst_22 = arith.constant 1.000000e+00 : f32
    %42 = vector.broadcast %cst_22 : f32 to vector<16x256xf32>
    %43 = arith.addf %42, %41 : vector<16x256xf32>
    %44 = arith.mulf %33, %43 : vector<16x256xf32>
    %45 = arith.truncf %44 : vector<16x256xf32> to vector<16x256xbf16>
    %c0_23 = arith.constant 0 : index
    %c0_24 = arith.constant 0 : index
    %46 = vector.load %arg8[%c0_23, %c0_24] : memref<256x128xbf16, #tpu.memory_space<vmem>>, vector<256x128xbf16>
    %cst_25 = arith.constant dense<0.000000e+00> : vector<16x128xf32>
    %47 = tpu.matmul %45, %46, %cst_25 {dimension_numbers = #tpu.dot_dimension_numbers<[1], [0], [0], [1], [0, 0, 1, 1], [], []>} : vector<16x256xbf16>, vector<256x128xbf16>, vector<16x128xf32> -> vector<16x128xf32>
    %c0_26 = arith.constant 0 : index
    %c0_27 = arith.constant 0 : index
    %48 = vector.load %arg9[%c0_26, %c0_27] : memref<1x128xf32, #tpu.memory_space<vmem>>, vector<1x128xf32>
    %49 = vector.broadcast %48 : vector<1x128xf32> to vector<16x128xf32>
    %50 = arith.addf %47, %49 : vector<16x128xf32>
    %cst_28 = arith.constant 5.000000e-01 : f32
    %51 = vector.broadcast %cst_28 : f32 to vector<16x128xf32>
    %52 = arith.mulf %51, %50 : vector<16x128xf32>
    %53 = arith.mulf %50, %50 : vector<16x128xf32>
    %54 = arith.mulf %53, %50 : vector<16x128xf32>
    %cst_29 = arith.constant 4.471500e-02 : f32
    %55 = vector.broadcast %cst_29 : f32 to vector<16x128xf32>
    %56 = arith.mulf %55, %54 : vector<16x128xf32>
    %57 = arith.addf %50, %56 : vector<16x128xf32>
    %cst_30 = arith.constant 0.797884583 : f32
    %58 = vector.broadcast %cst_30 : f32 to vector<16x128xf32>
    %59 = arith.mulf %58, %57 : vector<16x128xf32>
    %60 = math.tanh %59 : vector<16x128xf32>
    %cst_31 = arith.constant 1.000000e+00 : f32
    %61 = vector.broadcast %cst_31 : f32 to vector<16x128xf32>
    %62 = arith.addf %61, %60 : vector<16x128xf32>
    %63 = arith.mulf %52, %62 : vector<16x128xf32>
    %64 = arith.truncf %63 : vector<16x128xf32> to vector<16x128xbf16>
    %c0_32 = arith.constant 0 : index
    %c0_33 = arith.constant 0 : index
    %65 = vector.load %arg10[%c0_32, %c0_33] : memref<128x128xbf16, #tpu.memory_space<vmem>>, vector<128x128xbf16>
    %cst_34 = arith.constant dense<0.000000e+00> : vector<16x128xf32>
    %66 = tpu.matmul %64, %65, %cst_34 {dimension_numbers = #tpu.dot_dimension_numbers<[1], [0], [0], [1], [0, 0, 1, 1], [], []>} : vector<16x128xbf16>, vector<128x128xbf16>, vector<16x128xf32> -> vector<16x128xf32>
    %c0_35 = arith.constant 0 : index
    %c0_36 = arith.constant 0 : index
    %67 = vector.load %arg11[%c0_35, %c0_36] : memref<1x128xf32, #tpu.memory_space<vmem>>, vector<1x128xf32>
    %68 = vector.broadcast %67 : vector<1x128xf32> to vector<16x128xf32>
    %69 = arith.addf %66, %68 : vector<16x128xf32>
    %70 = arith.truncf %44 : vector<16x256xf32> to vector<16x256xbf16>
    %c0_37 = arith.constant 0 : index
    %c0_38 = arith.constant 0 : index
    %71 = vector.load %arg12[%c0_37, %c0_38] : memref<256x128xbf16, #tpu.memory_space<vmem>>, vector<256x128xbf16>
    %cst_39 = arith.constant dense<0.000000e+00> : vector<16x128xf32>
    %72 = tpu.matmul %70, %71, %cst_39 {dimension_numbers = #tpu.dot_dimension_numbers<[1], [0], [0], [1], [0, 0, 1, 1], [], []>} : vector<16x256xbf16>, vector<256x128xbf16>, vector<16x128xf32> -> vector<16x128xf32>
    %c0_40 = arith.constant 0 : index
    %c0_41 = arith.constant 0 : index
    %73 = vector.load %arg13[%c0_40, %c0_41] : memref<1x128xf32, #tpu.memory_space<vmem>>, vector<1x128xf32>
    %74 = vector.broadcast %73 : vector<1x128xf32> to vector<16x128xf32>
    %75 = arith.addf %72, %74 : vector<16x128xf32>
    %76 = arith.addf %69, %75 : vector<16x128xf32>
    %cst_42 = arith.constant 5.000000e-01 : f32
    %77 = vector.broadcast %cst_42 : f32 to vector<16x128xf32>
    %78 = arith.mulf %77, %76 : vector<16x128xf32>
    %79 = arith.mulf %76, %76 : vector<16x128xf32>
    %80 = arith.mulf %79, %76 : vector<16x128xf32>
    %cst_43 = arith.constant 4.471500e-02 : f32
    %81 = vector.broadcast %cst_43 : f32 to vector<16x128xf32>
    %82 = arith.mulf %81, %80 : vector<16x128xf32>
    %83 = arith.addf %76, %82 : vector<16x128xf32>
    %cst_44 = arith.constant 0.797884583 : f32
    %84 = vector.broadcast %cst_44 : f32 to vector<16x128xf32>
    %85 = arith.mulf %84, %83 : vector<16x128xf32>
    %86 = math.tanh %85 : vector<16x128xf32>
    %cst_45 = arith.constant 1.000000e+00 : f32
    %87 = vector.broadcast %cst_45 : f32 to vector<16x128xf32>
    %88 = arith.addf %87, %86 : vector<16x128xf32>
    %89 = arith.mulf %78, %88 : vector<16x128xf32>
    %90 = arith.truncf %89 : vector<16x128xf32> to vector<16x128xbf16>
    %c0_46 = arith.constant 0 : index
    %c0_47 = arith.constant 0 : index
    %91 = vector.load %arg14[%c0_46, %c0_47] : memref<128x128xbf16, #tpu.memory_space<vmem>>, vector<128x128xbf16>
    %cst_48 = arith.constant dense<0.000000e+00> : vector<16x128xf32>
    %92 = tpu.matmul %90, %91, %cst_48 {dimension_numbers = #tpu.dot_dimension_numbers<[1], [0], [0], [1], [0, 0, 1, 1], [], []>} : vector<16x128xbf16>, vector<128x128xbf16>, vector<16x128xf32> -> vector<16x128xf32>
    %c0_49 = arith.constant 0 : index
    %c0_50 = arith.constant 0 : index
    %93 = vector.load %arg15[%c0_49, %c0_50] : memref<1x128xf32, #tpu.memory_space<vmem>>, vector<1x128xf32>
    %94 = vector.broadcast %93 : vector<1x128xf32> to vector<16x128xf32>
    %95 = arith.addf %92, %94 : vector<16x128xf32>
    %c0_51 = arith.constant 0 : index
    %c0_52 = arith.constant 0 : index
    %96 = vector.load %arg16[%c0_51, %c0_52] : memref<16x128xf32, #tpu.memory_space<vmem>>, vector<16x128xf32>
    tpu.vector_store %arg16[%c0_51, %c0_52], %95 {strides = array<i32>} : memref<16x128xf32, #tpu.memory_space<vmem>>, vector<16x128xf32>,
    return
  }
  func.func @transform_0(%arg0: i32) -> (i32, i32) {
    %c0_i32 = arith.constant 0 : i32
    %c0_i32_0 = arith.constant 0 : i32
    return %arg0, %c0_i32 : i32, i32
  }
  func.func @transform_1(%arg0: i32) -> (i32, i32) {
    %c0_i32 = arith.constant 0 : i32
    %c0_i32_0 = arith.constant 0 : i32
    %c0_i32_1 = arith.constant 0 : i32
    return %c0_i32, %c0_i32_0 : i32, i32
  }
  func.func @transform_2(%arg0: i32) -> (i32, i32) {
    %c0_i32 = arith.constant 0 : i32
    %c0_i32_0 = arith.constant 0 : i32
    %c0_i32_1 = arith.constant 0 : i32
    return %c0_i32, %c0_i32_0 : i32, i32
  }
  func.func @transform_3(%arg0: i32) -> (i32, i32) {
    %c0_i32 = arith.constant 0 : i32
    %c0_i32_0 = arith.constant 0 : i32
    %c0_i32_1 = arith.constant 0 : i32
    return %c0_i32, %c0_i32_0 : i32, i32
  }
  func.func @transform_4(%arg0: i32) -> (i32, i32) {
    %c0_i32 = arith.constant 0 : i32
    %c0_i32_0 = arith.constant 0 : i32
    %c0_i32_1 = arith.constant 0 : i32
    return %c0_i32, %c0_i32_0 : i32, i32
  }
  func.func @transform_5(%arg0: i32) -> (i32, i32) {
    %c0_i32 = arith.constant 0 : i32
    %c0_i32_0 = arith.constant 0 : i32
    %c0_i32_1 = arith.constant 0 : i32
    return %c0_i32, %c0_i32_0 : i32, i32
  }
  func.func @transform_6(%arg0: i32) -> (i32, i32) {
    %c0_i32 = arith.constant 0 : i32
    %c0_i32_0 = arith.constant 0 : i32
    %c0_i32_1 = arith.constant 0 : i32
    return %c0_i32, %c0_i32_0 : i32, i32
  }
  func.func @transform_7(%arg0: i32) -> (i32, i32) {
    %c0_i32 = arith.constant 0 : i32
    %c0_i32_0 = arith.constant 0 : i32
    %c0_i32_1 = arith.constant 0 : i32
    return %c0_i32, %c0_i32_0 : i32, i32
  }
  func.func @transform_8(%arg0: i32) -> (i32, i32) {
    %c0_i32 = arith.constant 0 : i32
    %c0_i32_0 = arith.constant 0 : i32
    %c0_i32_1 = arith.constant 0 : i32
    return %c0_i32, %c0_i32_0 : i32, i32
  }
  func.func @transform_9(%arg0: i32) -> (i32, i32) {
    %c0_i32 = arith.constant 0 : i32
    %c0_i32_0 = arith.constant 0 : i32
    %c0_i32_1 = arith.constant 0 : i32
    return %c0_i32, %c0_i32_0 : i32, i32
  }
  func.func @transform_10(%arg0: i32) -> (i32, i32) {
    %c0_i32 = arith.constant 0 : i32
    %c0_i32_0 = arith.constant 0 : i32
    %c0_i32_1 = arith.constant 0 : i32
    return %c0_i32, %c0_i32_0 : i32, i32
  }
  func.func @transform_11(%arg0: i32) -> (i32, i32) {
    %c0_i32 = arith.constant 0 : i32
    %c0_i32_0 = arith.constant 0 : i32
    %c0_i32_1 = arith.constant 0 : i32
    return %c0_i32, %c0_i32_0 : i32, i32
  }
  func.func @transform_12(%arg0: i32) -> (i32, i32) {
    %c0_i32 = arith.constant 0 : i32
    %c0_i32_0 = arith.constant 0 : i32
    %c0_i32_1 = arith.constant 0 : i32
    return %c0_i32, %c0_i32_0 : i32, i32
  }
  func.func @transform_13(%arg0: i32) -> (i32, i32) {
    %c0_i32 = arith.constant 0 : i32
    %c0_i32_0 = arith.constant 0 : i32
    %c0_i32_1 = arith.constant 0 : i32
    return %c0_i32, %c0_i32_0 : i32, i32
  }
  func.func @transform_14(%arg0: i32) -> (i32, i32) {
    %c0_i32 = arith.constant 0 : i32
    %c0_i32_0 = arith.constant 0 : i32
    %c0_i32_1 = arith.constant 0 : i32
    return %c0_i32, %c0_i32_0 : i32, i32
  }
  func.func @transform_15(%arg0: i32) -> (i32, i32) {
    %c0_i32 = arith.constant 0 : i32
    %c0_i32_0 = arith.constant 0 : i32
    return %arg0, %c0_i32 : i32, i32
  }
}

</mosaic_0001>

<bundles_post_ra>
// kernel: tpu_custom_call.1
= control target key start
LH: loop header
LB: loop body
LE: loop exit
PB: predicated region body
PF: predicated region fallthrough
CT: control target
= control target key end

     0   :  { %20 = vsyncpa [#allocation3], 0  ;;  %s2656_s0 = inlined_call_operand.hbm [shape: bf16[16,256], index: 0, kind: input, shape index: {}]   ;;  %s2657_s1 = inlined_call_operand.hbm [shape: bf16[256,256], index: 1, kind: input, shape index: {}]   ;;  %s2658_s2 = inlined_call_operand.vmem [shape: f32[1,256], index: 2, kind: input, shape index: {}]   ;;  %s2659_s3 = inlined_call_operand.hbm [shape: bf16[256,256], index: 3, kind: input, shape index: {}]   ;;  %s2660_s4 = inlined_call_operand.vmem [shape: f32[1,256], index: 4, kind: input, shape index: {}]   ;;  %s2661_s5 = inlined_call_operand.hbm [shape: bf16[256,256], index: 5, kind: input, shape index: {}]   ;;  %s2662_s6 = inlined_call_operand.vmem [shape: f32[1,256], index: 6, kind: input, shape index: {}]   ;;  %s2663_s7 = inlined_call_operand.hbm [shape: bf16[256,128], index: 7, kind: input, shape index: {}]   ;;  %s2664_s8 = inlined_call_operand.vmem [shape: f32[1,128], index: 8, kind: input, shape index: {}]   ;;  %s2665_s9 = inlined_call_operand.hbm [shape: bf16[128,128], index: 9, kind: input, shape index: {}]   ;;  %s2666_s10 = inlined_call_operand.vmem [shape: f32[1,128], index: 10, kind: input, shape index: {}]   ;;  %s2667_s11 = inlined_call_operand.hbm [shape: bf16[256,128], index: 11, kind: input, shape index: {}]   ;;  %s2668_s12 = inlined_call_operand.vmem [shape: f32[1,128], index: 12, kind: input, shape index: {}]   ;;  %s2669_s13 = inlined_call_operand.hbm [shape: bf16[128,128], index: 13, kind: input, shape index: {}]   ;;  %s2670_s14 = inlined_call_operand.vmem [shape: f32[1,128], index: 14, kind: input, shape index: {}]   ;;  %s2671_s15 = inlined_call_operand.hbm [shape: f32[16,128], index: 15, kind: output, shape index: {}]  }
   0x1   :  { %21 = vsyncpa [#allocation6], 0 }
   0x2   :  { %22 = vsyncpa [#allocation9], 0 }
   0x3   :  { %23 = vsyncpa [#allocation12], 0 }
   0x4   :  { %24 = vsyncpa [#allocation15], 0 }
   0x5   :  { %25 = vsyncpa [#allocation4], 0  ;;  %s2331_s18 = smov [#allocation5]   ;;  %s2332_s20 = smov [#allocation8]  }
   0x6   :  { %s43_s19 = sshll.u32 %s2331_s18, 4  ;;  %s71_s21 = sshll.u32 %s2332_s20, 4  ;;  %s44_s19 = int_to_ptr.vmem [resolvable:$true] %s43_s19  ;;  %s2426_s21 = int_to_ptr.vmem [resolvable:$true] %s71_s21 }
   0x7   :  { %s2121_s24 = scalar_lea.hbm %s2657_s1, 4096 }
   0x8   :  { %p2122_p0 = scmp.ne.s32.totalorder %s2657_s1, %s2121_s24  ;;  %p2125_p1 = scmp.lt.u32.totalorder %s2121_s24, %s2657_s1 }
   0xa   :  { %p2127_p2 = pnand %p2125_p1, %p2122_p0 }
   0xc   :  { %2130 = shalt.err (!%p2127_p2)
}
   0xd   :  { %s2131_s29 = scalar_lea.vmem %s44_s19, 4096  ;;  %p2136_p4 = scmp.lt.s32.totalorder %s44_s19, %s44_s19 }
   0xe   :  { %p2132_p3 = scmp.ne.s32.totalorder %s44_s19, %s2131_s29  ;;  %p2137_p5 = scmp.lt.s32.totalorder %s2131_s29, %s2131_s29 }
  0x10   :  { %p2138_p6 = por %p2137_p5, %p2136_p4 }
  0x12   :  { %p2139_p7 = pnand %p2138_p6, %p2132_p3 }
  0x14   :  { %2142 = shalt.err (!%p2139_p7)
}
  0x15   :  { %s2333_s30 = smov 128   ;;  %s2334_s16 = smov 8  }
  0x16   :  { %49 = dma.hbm_to_vmem [thread:$0]  %s2657_s1, 4096, %s44_s19, [#allocation6], %s2333_s30, %s2333_s30, %s2334_s16  }
  0x17   :  { %s2143_s23 = scalar_lea.hbm %s2661_s5, 4096 }
  0x18   :  { %p2144_p8 = scmp.ne.s32.totalorder %s2661_s5, %s2143_s23  ;;  %p2147_p9 = scmp.lt.u32.totalorder %s2143_s23, %s2661_s5 }
  0x1a   :  { %p2149_p10 = pnand %p2147_p9, %p2144_p8 }
  0x1c   :  { %2152 = shalt.err (!%p2149_p10)
}
  0x1d   :  { %s2153_s28 = scalar_lea.vmem %s2426_s21, 4096  ;;  %p2158_p12 = scmp.lt.s32.totalorder %s2426_s21, %s2426_s21 }
  0x1e   :  { %p2154_p11 = scmp.ne.s32.totalorder %s2426_s21, %s2153_s28  ;;  %p2159_p13 = scmp.lt.s32.totalorder %s2153_s28, %s2153_s28 }
  0x20   :  { %p2160_p0 = por %p2159_p13, %p2158_p12 }
  0x22   :  { %p2161_p1 = pnand %p2160_p0, %p2154_p11 }
  0x24   :  { %2164 = shalt.err (!%p2161_p1)
}
  0x25   :  { %77 = dma.hbm_to_vmem [thread:$0]  %s2661_s5, 4096, %s2426_s21, [#allocation9], %s2333_s30, %s2333_s30, %s2334_s16  }
  0x26   :  { %s2335_s29 = smov [#allocation11]   ;;  %s2336_s18 = smov [#allocation2]  }
  0x27   :  { %s99_s17 = sshll.u32 %s2335_s29, 4  ;;  %s31_s20 = sshll.u32 %s2336_s18, 4  ;;  %s100_s17 = int_to_ptr.vmem [resolvable:$true] %s99_s17  ;;  %s2463_s20 = int_to_ptr.vmem [resolvable:$true] %s31_s20 }
  0x28   :  { %s2165_s24 = scalar_lea.hbm %s2665_s9, 1024 }
  0x29   :  { %p2166_p2 = scmp.ne.s32.totalorder %s2665_s9, %s2165_s24  ;;  %p2169_p3 = scmp.lt.u32.totalorder %s2165_s24, %s2665_s9 }
  0x2b   :  { %p2171_p4 = pnand %p2169_p3, %p2166_p2 }
  0x2d   :  { %2174 = shalt.err (!%p2171_p4)
}
  0x2e   :  { %s2175_s5 = scalar_lea.vmem %s100_s17, 1024  ;;  %p2180_p6 = scmp.lt.s32.totalorder %s100_s17, %s100_s17 }
  0x2f   :  { %p2176_p5 = scmp.ne.s32.totalorder %s100_s17, %s2175_s5  ;;  %p2181_p7 = scmp.lt.s32.totalorder %s2175_s5, %s2175_s5 }
  0x31   :  { %p2182_p8 = por %p2181_p7, %p2180_p6 }
  0x33   :  { %p2183_p9 = pnand %p2182_p8, %p2176_p5 }
  0x35   :  { %2186 = shalt.err (!%p2183_p9)
}
  0x36   :  { %s2337_s21 = smov 64   ;;  %s2338_s1 = smov 4  }
  0x37   :  { %105 = dma.hbm_to_vmem [thread:$0]  %s2665_s9, 1024, %s100_s17, [#allocation12], %s2337_s21, %s2337_s21, %s2338_s1  }
  0x38   :  { %s2187_s23 = scalar_lea.hbm %s2656_s0, 256 }
  0x39   :  { %p2188_p10 = scmp.ne.s32.totalorder %s2656_s0, %s2187_s23  ;;  %p2191_p11 = scmp.lt.u32.totalorder %s2187_s23, %s2656_s0 }
  0x3b   :  { %p2193_p12 = pnand %p2191_p11, %p2188_p10 }
  0x3d   :  { %2196 = shalt.err (!%p2193_p12)
}
  0x3e   :  { %s2197_s28 = scalar_lea.vmem %s2463_s20, 256  ;;  %p2202_p0 = scmp.lt.s32.totalorder %s2463_s20, %s2463_s20 }
  0x3f   :  { %p2198_p13 = scmp.ne.s32.totalorder %s2463_s20, %s2197_s28  ;;  %p2203_p1 = scmp.lt.s32.totalorder %s2197_s28, %s2197_s28 }
  0x41   :  { %p2204_p2 = por %p2203_p1, %p2202_p0 }
  0x43   :  { %p2205_p3 = pnand %p2204_p2, %p2198_p13 }
  0x45   :  { %2208 = shalt.err (!%p2205_p3)
}
  0x46   :  { %37 = dma.hbm_to_vmem [thread:$0]  %s2656_s0, 256, %s2463_s20, [#allocation3], %s2333_s30, %s2333_s30, %s2334_s16  }
  0x47   :  { %s2339_s5 = smov [#allocation7]   ;;  %s2340_s29 = smov [#allocation10]  }
  0x48   :  { %s57_s19 = sshll.u32 %s2339_s5, 4  ;;  %s85_s18 = sshll.u32 %s2340_s29, 4  ;;  %s58_s19 = int_to_ptr.vmem [resolvable:$true] %s57_s19  ;;  %s2500_s18 = int_to_ptr.vmem [resolvable:$true] %s85_s18 }
  0x49   :  { %s2209_s24 = scalar_lea.hbm %s2659_s3, 4096 }
  0x4a   :  { %p2210_p4 = scmp.ne.s32.totalorder %s2659_s3, %s2209_s24  ;;  %p2213_p5 = scmp.lt.u32.totalorder %s2209_s24, %s2659_s3 }
  0x4c   :  { %p2215_p6 = pnand %p2213_p5, %p2210_p4 }
  0x4e   :  { %2218 = shalt.err (!%p2215_p6)
}
  0x4f   :  { %s2219_s0 = scalar_lea.vmem %s58_s19, 4096  ;;  %p2224_p8 = scmp.lt.s32.totalorder %s58_s19, %s58_s19 }
  0x50   :  { %p2220_p7 = scmp.ne.s32.totalorder %s58_s19, %s2219_s0  ;;  %p2225_p9 = scmp.lt.s32.totalorder %s2219_s0, %s2219_s0 }
  0x52   :  { %p2226_p10 = por %p2225_p9, %p2224_p8 }
  0x54   :  { %p2227_p11 = pnand %p2226_p10, %p2220_p7 }
  0x56   :  { %2230 = shalt.err (!%p2227_p11)
}
  0x57   :  { %63 = dma.hbm_to_vmem [thread:$0]  %s2659_s3, 4096, %s58_s19, [#allocation6], %s2333_s30, %s2333_s30, %s2334_s16  }
  0x58   :  { %s2231_s29 = scalar_lea.hbm %s2663_s7, 2048 }
  0x59   :  { %p2232_p12 = scmp.ne.s32.totalorder %s2663_s7, %s2231_s29  ;;  %p2235_p13 = scmp.lt.u32.totalorder %s2231_s29, %s2663_s7 }
  0x5b   :  { %p2237_p0 = pnand %p2235_p13, %p2232_p12 }
  0x5d   :  { %2240 = shalt.err (!%p2237_p0)
}
  0x5e   :  { %s2241_s26 = scalar_lea.vmem %s2500_s18, 2048  ;;  %p2246_p2 = scmp.lt.s32.totalorder %s2500_s18, %s2500_s18 }
  0x5f   :  { %p2242_p1 = scmp.ne.s32.totalorder %s2500_s18, %s2241_s26  ;;  %p2247_p3 = scmp.lt.s32.totalorder %s2241_s26, %s2241_s26 }
  0x61   :  { %p2248_p4 = por %p2247_p3, %p2246_p2 }
  0x63   :  { %p2249_p5 = pnand %p2248_p4, %p2242_p1 }
  0x65   :  { %2252 = shalt.err (!%p2249_p5)
}
  0x66   :  { %91 = dma.hbm_to_vmem [thread:$0]  %s2663_s7, 2048, %s2500_s18, [#allocation9], %s2337_s21, %s2337_s21, %s2338_s1  }
  0x67   :  { %s2341_s27 = smov [#allocation13]   ;;  %s2342_s0 = smov [#allocation14]  }
  0x68   :  { %s113_s28 = sshll.u32 %s2341_s27, 4  ;;  %s127_s20 = sshll.u32 %s2342_s0, 4  ;;  %s114_s28 = int_to_ptr.vmem [resolvable:$true] %s113_s28  ;;  %s2537_s20 = int_to_ptr.vmem [resolvable:$true] %s127_s20 }
  0x69   :  { %s2253_s5 = scalar_lea.hbm %s2667_s11, 2048 }
  0x6a   :  { %p2254_p6 = scmp.ne.s32.totalorder %s2667_s11, %s2253_s5  ;;  %p2257_p7 = scmp.lt.u32.totalorder %s2253_s5, %s2667_s11 }
  0x6c   :  { %p2259_p8 = pnand %p2257_p7, %p2254_p6 }
  0x6e   :  { %2262 = shalt.err (!%p2259_p8)
}
  0x6f   :  { %s2263_s7 = scalar_lea.vmem %s114_s28, 2048  ;;  %p2268_p10 = scmp.lt.s32.totalorder %s114_s28, %s114_s28 }
  0x70   :  { %p2264_p9 = scmp.ne.s32.totalorder %s114_s28, %s2263_s7  ;;  %p2269_p11 = scmp.lt.s32.totalorder %s2263_s7, %s2263_s7 }
  0x72   :  { %p2270_p12 = por %p2269_p11, %p2268_p10 }
  0x74   :  { %p2271_p13 = pnand %p2270_p12, %p2264_p9 }
  0x76   :  { %2274 = shalt.err (!%p2271_p13)
}
  0x77   :  { %119 = dma.hbm_to_vmem [thread:$0]  %s2667_s11, 2048, %s114_s28, [#allocation12], %s2337_s21, %s2337_s21, %s2338_s1  }
  0x78   :  { %s2275_s19 = scalar_lea.hbm %s2669_s13, 1024 }
  0x79   :  { %p2276_p0 = scmp.ne.s32.totalorder %s2669_s13, %s2275_s19  ;;  %p2279_p1 = scmp.lt.u32.totalorder %s2275_s19, %s2669_s13 }
  0x7b   :  { %p2281_p2 = pnand %p2279_p1, %p2276_p0 }
  0x7d   :  { %2284 = shalt.err (!%p2281_p2)
}
  0x7e   :  { %s2285_s5 = scalar_lea.vmem %s2537_s20, 1024  ;;  %p2290_p4 = scmp.lt.s32.totalorder %s2537_s20, %s2537_s20 }
  0x7f   :  { %p2286_p3 = scmp.ne.s32.totalorder %s2537_s20, %s2285_s5  ;;  %p2291_p5 = scmp.lt.s32.totalorder %s2285_s5, %s2285_s5 }
  0x81   :  { %p2292_p6 = por %p2291_p5, %p2290_p4 }
  0x83   :  { %p2293_p7 = pnand %p2292_p6, %p2286_p3 }
  0x85   :  { %2296 = shalt.err (!%p2293_p7)
}
  0x86   :  { %133 = dma.hbm_to_vmem [thread:$0]  %s2669_s13, 1024, %s2537_s20, [#allocation15], %s2337_s21, %s2337_s21, %s2338_s1  }
  0x87   :  { %2319 = dma.done.wait [#allocation3], 256  }
  0x88   :  { %2320 = vsyncadd [#allocation3], 4294967040 }
  0x89   :  { %2321 = dma.done.wait [#allocation6], 8192  }
  0x8a   :  { %2322 = vsyncadd [#allocation6], 4294959104 }
  0x8b   :  { %2323 = dma.done.wait [#allocation9], 6144  }
  0x8c   :  { %2324 = vsyncadd [#allocation9], 4294961152 }
  0x8d   :  { %2325 = dma.done.wait [#allocation12], 3072  }
  0x8e   :  { %2326 = vsyncadd [#allocation12], 4294964224 }
  0x8f   :  { %2327 = dma.done.wait [#allocation15], 1024  }
  0x90   :  { %2328 = vsyncadd [#allocation15], 4294966272  ;;  %v1902_v0 = vld [vmem:[#allocation5 + $0x4] ss:$8 sps:$4 sm:$0xff]   ;;  %v1904_v1 = vld [vmem:[#allocation5] ss:$8 sps:$4 sm:$0xff]  }
  0x91   :  { %377 = vmatprep.subr.bf16.mxu0 %v1902_v0  ;;  %v1905_v2 = vld [vmem:[#allocation5 + $0x14] ss:$8 sps:$4 sm:$0xff]   ;;  %v1907_v3 = vld [vmem:[#allocation5 + $0x10] ss:$8 sps:$4 sm:$0xff]   ;;  %v1908_v4 = vld [vmem:[#allocation5 + $0x24] ss:$8 sps:$4 sm:$0xff]  }
  0x92   :  { %378 = vmatpush1.bf16.msra.mxu0 %v1904_v1  ;;  %v1910_v5 = vld [vmem:[#allocation5 + $0x20] ss:$8 sps:$4 sm:$0xff]   ;;  %v1911_v6 = vld [vmem:[#allocation5 + $0x34] ss:$8 sps:$4 sm:$0xff]   ;;  %v1913_v7 = vld [vmem:[#allocation5 + $0x30] ss:$8 sps:$4 sm:$0xff]  }
  0x93   :  { %379 = vmatprep.subr.bf16.mxu0 %v1905_v2  ;;  %v1914_v8 = vld [vmem:[#allocation5 + $0x44] ss:$8 sps:$4 sm:$0xff]   ;;  %v1916_v9 = vld [vmem:[#allocation5 + $0x40] ss:$8 sps:$4 sm:$0xff]   ;;  %v1917_v10 = vld [vmem:[#allocation5 + $0x54] ss:$8 sps:$4 sm:$0xff]  }
  0x94   :  { %v1919_v11 = vld [vmem:[#allocation5 + $0x50] ss:$8 sps:$4 sm:$0xff]   ;;  %v1920_v12 = vld [vmem:[#allocation5 + $0x64] ss:$8 sps:$4 sm:$0xff]   ;;  %v1922_v13 = vld [vmem:[#allocation5 + $0x60] ss:$8 sps:$4 sm:$0xff]  }
  0x95   :  { %v1923_v14 = vld [vmem:[#allocation5 + $0x74] ss:$8 sps:$4 sm:$0xff]   ;;  %v1953_v16 = vld [vmem:[#allocation7 + $0x4] ss:$8 sps:$4 sm:$0xff]   ;;  %v1955_v17 = vld [vmem:[#allocation7] ss:$8 sps:$4 sm:$0xff]  }
  0x96   :  { %380 = vmatpush1.bf16.msra.mxu0 %v1907_v3  ;;  %v1952_v15 = vld [vmem:[#allocation2 + $0x4] ss:$8 sps:$4 sm:$0xff]   ;;  %626 = vmatprep.subr.bf16.mxu1 %v1953_v16  ;;  %v1958_v19 = vld [vmem:[#allocation7 + $0x10] ss:$8 sps:$4 sm:$0xff]   ;;  %v1959_v21 = vld [vmem:[#allocation7 + $0x24] ss:$8 sps:$4 sm:$0xff]  }
  0x97   :  { %381 = vmatprep.subr.bf16.mxu0 %v1908_v4  ;;  %409 = vmatprep.mubr.bf16.mxu0 %v1952_v15  ;;  %v1956_v18 = vld [vmem:[#allocation7 + $0x14] ss:$8 sps:$4 sm:$0xff]   ;;  %v1925_v20 = vld [vmem:[#allocation5 + $0x70] ss:$8 sps:$4 sm:$0xff]   ;;  %v1926_v22 = vld [vmem:[#allocation5 + $0x84] ss:$8 sps:$4 sm:$0xff]  }
  0x98   :  { %627 = vmatpush1.bf16.msra.mxu1 %v1955_v17  ;;  %v1961_v23 = vld [vmem:[#allocation7 + $0x20] ss:$8 sps:$4 sm:$0xff]   ;;  %v1962_v25 = vld [vmem:[#allocation7 + $0x34] ss:$8 sps:$4 sm:$0xff]   ;;  %v1964_v27 = vld [vmem:[#allocation7 + $0x30] ss:$8 sps:$4 sm:$0xff]  }
  0x99   :  { %628 = vmatprep.subr.bf16.mxu1 %v1956_v18  ;;  %v1928_v24 = vld [vmem:[#allocation5 + $0x80] ss:$8 sps:$4 sm:$0xff]   ;;  %v1929_v26 = vld [vmem:[#allocation5 + $0x94] ss:$8 sps:$4 sm:$0xff]   ;;  %v1931_v28 = vld [vmem:[#allocation5 + $0x90] ss:$8 sps:$4 sm:$0xff]   ;;  %v197_v18 = vlaneseq }
  0x9a   :  { %382 = vmatpush1.bf16.msra.mxu0 %v1910_v5  ;;  %v1965_v29 = vld [vmem:[#allocation7 + $0x44] ss:$8 sps:$4 sm:$0xff]   ;;  %v1967_v31 = vld [vmem:[#allocation7 + $0x40] ss:$8 sps:$4 sm:$0xff]   ;;  %v1968_v33 = vld [vmem:[#allocation7 + $0x54] ss:$8 sps:$4 sm:$0xff]  }
  0x9b   :  { %383 = vmatprep.subr.bf16.mxu0 %v1911_v6  ;;  %v1932_v30 = vld [vmem:[#allocation5 + $0xa4] ss:$8 sps:$4 sm:$0xff]   ;;  %v1934_v32 = vld [vmem:[#allocation5 + $0xa0] ss:$8 sps:$4 sm:$0xff]   ;;  %v1935_v34 = vld [vmem:[#allocation5 + $0xb4] ss:$8 sps:$4 sm:$0xff]  }
  0x9c   :  { %629 = vmatpush1.bf16.msra.mxu1 %v1958_v19  ;;  %v1937_v35 = vld [vmem:[#allocation5 + $0xb0] ss:$8 sps:$4 sm:$0xff]   ;;  %v1971_v37 = vld [vmem:[#allocation7 + $0x64] ss:$8 sps:$4 sm:$0xff]   ;;  %v1973_v39 = vld [vmem:[#allocation7 + $0x60] ss:$8 sps:$4 sm:$0xff]  }
  0x9d   :  { %630 = vmatprep.subr.bf16.mxu1 %v1959_v21  ;;  %v1970_v36 = vld [vmem:[#allocation7 + $0x50] ss:$8 sps:$4 sm:$0xff]   ;;  %v1938_v38 = vld [vmem:[#allocation5 + $0xc4] ss:$8 sps:$4 sm:$0xff]   ;;  %v1940_v40 = vld [vmem:[#allocation5 + $0xc0] ss:$8 sps:$4 sm:$0xff]  }
  0x9e   :  { %384 = vmatpush1.bf16.msra.mxu0 %v1913_v7  ;;  %v1974_v41 = vld [vmem:[#allocation7 + $0x74] ss:$8 sps:$4 sm:$0xff]   ;;  %v1976_v43 = vld [vmem:[#allocation7 + $0x70] ss:$8 sps:$4 sm:$0xff]   ;;  %v1977_v45 = vld [vmem:[#allocation7 + $0x84] ss:$8 sps:$4 sm:$0xff]  }
  0x9f   :  { %385 = vmatprep.subr.bf16.mxu0 %v1914_v8  ;;  %v1941_v42 = vld [vmem:[#allocation5 + $0xd4] ss:$8 sps:$4 sm:$0xff]   ;;  %v1943_v44 = vld [vmem:[#allocation5 + $0xd0] ss:$8 sps:$4 sm:$0xff]   ;;  %v1944_v46 = vld [vmem:[#allocation5 + $0xe4] ss:$8 sps:$4 sm:$0xff]  }
  0xa0   :  { %631 = vmatpush1.bf16.msra.mxu1 %v1961_v23  ;;  %v1979_v47 = vld [vmem:[#allocation7 + $0x80] ss:$8 sps:$4 sm:$0xff]   ;;  %v1980_v49 = vld [vmem:[#allocation7 + $0x94] ss:$8 sps:$4 sm:$0xff]   ;;  %v1982_v51 = vld [vmem:[#allocation7 + $0x90] ss:$8 sps:$4 sm:$0xff]  }
  0xa1   :  { %632 = vmatprep.subr.bf16.mxu1 %v1962_v25  ;;  %v1946_v48 = vld [vmem:[#allocation5 + $0xe0] ss:$8 sps:$4 sm:$0xff]   ;;  %v1947_v50 = vld [vmem:[#allocation5 + $0xf4] ss:$8 sps:$4 sm:$0xff]   ;;  %v1949_v52 = vld [vmem:[#allocation5 + $0xf0] ss:$8 sps:$4 sm:$0xff]  }
  0xa2   :  { %386 = vmatpush1.bf16.msra.mxu0 %v1916_v9  ;;  %v1983_v53 = vld [vmem:[#allocation7 + $0xa4] ss:$8 sps:$4 sm:$0xff]   ;;  %v1950_v54 = vld [vmem:[#allocation2] ss:$8 sps:$4 sm:$0xff]   ;;  %v1985_v55 = vld [vmem:[#allocation7 + $0xa0] ss:$8 sps:$4 sm:$0xff]  }
  0xa3   :  { %387 = vmatprep.subr.bf16.mxu0 %v1917_v10  ;;  %v1986_v56 = vld [vmem:[#allocation7 + $0xb4] ss:$8 sps:$4 sm:$0xff]   ;;  %v1988_v57 = vld [vmem:[#allocation7 + $0xb0] ss:$8 sps:$4 sm:$0xff]   ;;  %v1989_v58 = vld [vmem:[#allocation7 + $0xc4] ss:$8 sps:$4 sm:$0xff]  }
  0xa4   :  { %633 = vmatpush1.bf16.msra.mxu1 %v1964_v27  ;;  %v1991_v59 = vld [vmem:[#allocation7 + $0xc0] ss:$8 sps:$4 sm:$0xff]   ;;  %v1992_v60 = vld [vmem:[#allocation7 + $0xd4] ss:$8 sps:$4 sm:$0xff]   ;;  %v1994_v61 = vld [vmem:[#allocation7 + $0xd0] ss:$8 sps:$4 sm:$0xff]  }
  0xa5   :  { %634 = vmatprep.subr.bf16.mxu1 %v1965_v29  ;;  %v1995_v62 = vld [vmem:[#allocation7 + $0xe4] ss:$8 sps:$4 sm:$0xff]   ;;  %v1997_v63 = vld [vmem:[#allocation7 + $0xe0] ss:$8 sps:$4 sm:$0xff]   ;;  %v1998_v0 = vld [vmem:[#allocation7 + $0xf4] ss:$8 sps:$4 sm:$0xff]  }
  0xa6   :  { %388 = vmatpush1.bf16.msra.mxu0 %v1919_v11  ;;  %v2000_v1 = vld [vmem:[#allocation7 + $0xf0] ss:$8 sps:$4 sm:$0xff]   ;;  %v2001_v2 = vld [vmem:[#allocation8] ss:$8 sps:$4 sm:$0xff]   ;;  %v2003_v3 = vld [vmem:[#allocation8 + $0x4] ss:$8 sps:$4 sm:$0xff]  }
  0xa7   :  { %389 = vmatprep.subr.bf16.mxu0 %v1920_v12  ;;  %v2006_v4 = vld [vmem:[#allocation8 + $0x14] ss:$8 sps:$4 sm:$0xff]   ;;  %v2004_v5 = vld [vmem:[#allocation8 + $0x10] ss:$8 sps:$4 sm:$0xff]   ;;  %v2009_v6 = vld [vmem:[#allocation8 + $0x24] ss:$8 sps:$4 sm:$0xff]  }
  0xa8   :  { %635 = vmatpush1.bf16.msra.mxu1 %v1967_v31  ;;  %v2007_v7 = vld [vmem:[#allocation8 + $0x20] ss:$8 sps:$4 sm:$0xff]   ;;  %v2012_v8 = vld [vmem:[#allocation8 + $0x34] ss:$8 sps:$4 sm:$0xff]   ;;  %v2010_v9 = vld [vmem:[#allocation8 + $0x30] ss:$8 sps:$4 sm:$0xff]  }
  0xa9   :  { %636 = vmatprep.subr.bf16.mxu1 %v1968_v33  ;;  %v2015_v10 = vld [vmem:[#allocation8 + $0x44] ss:$8 sps:$4 sm:$0xff]   ;;  %v2013_v11 = vld [vmem:[#allocation8 + $0x40] ss:$8 sps:$4 sm:$0xff]   ;;  %v2018_v12 = vld [vmem:[#allocation8 + $0x54] ss:$8 sps:$4 sm:$0xff]  }
  0xaa   :  { %390 = vmatpush1.bf16.msra.mxu0 %v1922_v13  ;;  %v2016_v13 = vld [vmem:[#allocation8 + $0x50] ss:$8 sps:$4 sm:$0xff]   ;;  %v2019_v15 = vld [vmem:[#allocation8 + $0x60] ss:$8 sps:$4 sm:$0xff]   ;;  %v2024_v16 = vld [vmem:[#allocation8 + $0x74] ss:$8 sps:$4 sm:$0xff]  }
  0xab   :  { %391 = vmatprep.subr.bf16.mxu0 %v1923_v14  ;;  %v2021_v14 = vld [vmem:[#allocation8 + $0x64] ss:$8 sps:$4 sm:$0xff]   ;;  %v2022_v17 = vld [vmem:[#allocation8 + $0x70] ss:$8 sps:$4 sm:$0xff]   ;;  %v198_v19 = vshrl.u32 %v197_v18, 7  ;;  %vm2344_vm0 = vmmov 0  }
  0xac   :  { %637 = vmatpush1.bf16.msra.mxu1 %v1970_v36  ;;  %v195_v21 = vld [vmem:[%s2658_s2] sm:$0x3]  ;;  %v2025_v36 = vld [vmem:[#allocation8 + $0x80] ss:$8 sps:$4 sm:$0xff]   ;;  %s2345_s7 = smov [#allocation16]  }
  0xad   :  { %638 = vmatprep.subr.bf16.mxu1 %v1971_v37  ;;  %v2030_v37 = vld [vmem:[#allocation8 + $0x94] ss:$8 sps:$4 sm:$0xff]   ;;  %s1619_s18 = sshll.u32 %s2345_s7, 4  ;;  %s1620_s18 = int_to_ptr.vmem [resolvable:$true] %s1619_s18 }
  0xae   :  { %392 = vmatpush1.bf16.msra.mxu0 %v1925_v20  ;;  %v2574_v20 = vsub.s32 1, %v198_v19  ;;  %s2297_s25 = scalar_lea.vmem %s1620_s18, 256  ;;  %p2302_p9 = scmp.lt.s32.totalorder %s1620_s18, %s1620_s18 }
  0xaf   :  { %393 = vmatprep.subr.bf16.mxu0 %v1926_v22  ;;  %v2579_v22 = vsub.s32 0, %v198_v19  ;;  %p2298_p8 = scmp.ne.s32.totalorder %s1620_s18, %s2297_s25  ;;  %p2303_p10 = scmp.lt.s32.totalorder %s2297_s25, %s2297_s25 }
  0xb0   :  { %639 = vmatpush1.bf16.msra.mxu1 %v1973_v39  ;;  %v2033_v39 = vld [vmem:[#allocation8 + $0xa4] ss:$8 sps:$4 sm:$0xff]  }
  0xb1   :  { %640 = vmatprep.subr.bf16.mxu1 %v1974_v41  ;;  %v200_v25 = vrot.slane %v195_v21, %v2579_v22  ;;  %v2036_v41 = vld [vmem:[#allocation8 + $0xb4] ss:$8 sps:$4 sm:$0xff]   ;;  %p2304_p11 = por %p2303_p10, %p2302_p9 }
  0xb2   :  { %394 = vmatpush1.bf16.msra.mxu0 %v1928_v24  ;;  %v204_v24 = vrot.slane %v195_v21, %v2574_v20 }
  0xb3   :  { %395 = vmatprep.subr.bf16.mxu0 %v1929_v26  ;;  %p2305_p12 = pnand %p2304_p11, %p2298_p8 }
  0xb4   :  { %641 = vmatpush1.bf16.msra.mxu1 %v1976_v43  ;;  %v2037_v43 = vld [vmem:[#allocation8 + $0xc0] ss:$8 sps:$4 sm:$0xff]  }
  0xb5   :  { %642 = vmatprep.subr.bf16.mxu1 %v1977_v45  ;;  %v2042_v45 = vld [vmem:[#allocation8 + $0xd4] ss:$8 sps:$4 sm:$0xff]  }
  0xb6   :  { %396 = vmatpush1.bf16.msra.mxu0 %v1931_v28 }
  0xb7   :  { %397 = vmatprep.subr.bf16.mxu0 %v1932_v30 }
  0xb8   :  { %643 = vmatpush1.bf16.msra.mxu1 %v1979_v47  ;;  %v2045_v47 = vld [vmem:[#allocation8 + $0xe4] ss:$8 sps:$4 sm:$0xff]  }
  0xb9   :  { %644 = vmatprep.subr.bf16.mxu1 %v1980_v49  ;;  %v2048_v49 = vld [vmem:[#allocation8 + $0xf4] ss:$8 sps:$4 sm:$0xff]  }
  0xba   :  { %398 = vmatpush1.bf16.msra.mxu0 %v1934_v32 }
  0xbb   :  { %399 = vmatprep.subr.bf16.mxu0 %v1935_v34 }
  0xbc   :  { %645 = vmatpush1.bf16.msra.mxu1 %v1982_v51  ;;  %v454_v51 = vld [vmem:[%s2660_s4] sm:$0x3] }
  0xbd   :  { %646 = vmatprep.subr.bf16.mxu1 %v1983_v53  ;;  %v463_v53 = vrot.slane %v454_v51, %v2574_v20 }
  0xbe   :  { %400 = vmatpush1.bf16.msra.mxu0 %v1937_v35  ;;  %v2027_v35 = vld [vmem:[#allocation8 + $0x84] ss:$8 sps:$4 sm:$0xff]  }
  0xbf   :  { %401 = vmatprep.subr.bf16.mxu0 %v1938_v38  ;;  %v2028_v38 = vld [vmem:[#allocation8 + $0x90] ss:$8 sps:$4 sm:$0xff]  }
  0xc0   :  { %647 = vmatpush1.bf16.msra.mxu1 %v1985_v55 }
  0xc1   :  { %648 = vmatprep.subr.bf16.mxu1 %v1986_v56 }
  0xc2   :  { %402 = vmatpush1.bf16.msra.mxu0 %v1940_v40  ;;  %v2031_v40 = vld [vmem:[#allocation8 + $0xa0] ss:$8 sps:$4 sm:$0xff]  }
  0xc3   :  { %403 = vmatprep.subr.bf16.mxu0 %v1941_v42  ;;  %v2034_v42 = vld [vmem:[#allocation8 + $0xb0] ss:$8 sps:$4 sm:$0xff]  }
  0xc4   :  { %649 = vmatpush1.bf16.msra.mxu1 %v1988_v57 }
  0xc5   :  { %650 = vmatprep.subr.bf16.mxu1 %v1989_v58 }
  0xc6   :  { %404 = vmatpush1.bf16.msra.mxu0 %v1943_v44  ;;  %v2039_v44 = vld [vmem:[#allocation8 + $0xc4] ss:$8 sps:$4 sm:$0xff]  }
  0xc7   :  { %405 = vmatprep.subr.bf16.mxu0 %v1944_v46  ;;  %v2040_v46 = vld [vmem:[#allocation8 + $0xd0] ss:$8 sps:$4 sm:$0xff]  }
  0xc8   :  { %651 = vmatpush1.bf16.msra.mxu1 %v1991_v59 }
  0xc9   :  { %652 = vmatprep.subr.bf16.mxu1 %v1992_v60 }
  0xca   :  { %406 = vmatpush1.bf16.msra.mxu0 %v1946_v48  ;;  %v2043_v48 = vld [vmem:[#allocation8 + $0xe0] ss:$8 sps:$4 sm:$0xff]  }
  0xcb   :  { %407 = vmatprep.subr.bf16.mxu0 %v1947_v50  ;;  %v2046_v50 = vld [vmem:[#allocation8 + $0xf0] ss:$8 sps:$4 sm:$0xff]  }
  0xcc   :  { %653 = vmatpush1.bf16.msra.mxu1 %v1994_v61 }
  0xcd   :  { %654 = vmatprep.subr.bf16.mxu1 %v1995_v62 }
  0xce   :  { %408 = vmatpush1.bf16.msra.mxu0 %v1949_v52  ;;  %v459_v52 = vrot.slane %v454_v51, %v2579_v22  ;;  %v2058_v51 = vld [vmem:[#allocation13 + $0x50] sm:$0xff]  }
  0xcf   :  { %911 = vmatprep.subr.bf16.mxu0 %v2003_v3 }
  0xd0   :  { %655 = vmatpush1.bf16.msra.mxu1 %v1997_v63 }
  0xd1   :  { %410 = vmatmul.mubr.bf16.vlgmr.msra.gmra.mrb[0].mxu0 %v1950_v54  ;;  %656 = vmatprep.subr.bf16.mxu1 %v1998_v0 }
  0xd2   :  { %912 = vmatpush1.bf16.msra.mxu0 %v2001_v2 }
  0xd3   :  { %913 = vmatprep.subr.bf16.mxu0 %v2006_v4 }
  0xd4   :  { %657 = vmatpush1.bf16.msra.mxu1 %v2000_v1 }
  0xd6   :  { %914 = vmatpush1.bf16.msra.mxu0 %v2004_v5 }
  0xd7   :  { %915 = vmatprep.subr.bf16.mxu0 %v2009_v6 }
  0xda   :  { %916 = vmatpush1.bf16.msra.mxu0 %v2007_v7 }
  0xdb   :  { %917 = vmatprep.subr.bf16.mxu0 %v2012_v8 }
  0xde   :  { %918 = vmatpush1.bf16.msra.mxu0 %v2010_v9 }
  0xdf   :  { %919 = vmatprep.subr.bf16.mxu0 %v2015_v10 }
  0xe2   :  { %920 = vmatpush1.bf16.msra.mxu0 %v2013_v11 }
  0xe3   :  { %921 = vmatprep.subr.bf16.mxu0 %v2018_v12 }
  0xe6   :  { %922 = vmatpush1.bf16.msra.mxu0 %v2016_v13 }
  0xe7   :  { %923 = vmatprep.subr.bf16.mxu0 %v2021_v14 }
  0xea   :  { %924 = vmatpush1.bf16.msra.mxu0 %v2019_v15 }
  0xeb   :  { %925 = vmatprep.subr.bf16.mxu0 %v2024_v16 }
  0xee   :  { %926 = vmatpush1.bf16.msra.mxu0 %v2022_v17 }
  0xef   :  { %927 = vmatprep.subr.bf16.mxu0 %v2027_v35 }
  0xf2   :  { %928 = vmatpush1.bf16.msra.mxu0 %v2025_v36 }
  0xf3   :  { %929 = vmatprep.subr.bf16.mxu0 %v2030_v37 }
  0xf6   :  { %930 = vmatpush1.bf16.msra.mxu0 %v2028_v38 }
  0xf7   :  { %931 = vmatprep.subr.bf16.mxu0 %v2033_v39 }
  0xfa   :  { %932 = vmatpush1.bf16.msra.mxu0 %v2031_v40 }
  0xfb   :  { %933 = vmatprep.subr.bf16.mxu0 %v2036_v41 }
  0xfe   :  { %934 = vmatpush1.bf16.msra.mxu0 %v2034_v42  ;;  %v2049_v42 = vld [vmem:[#allocation10 + $0x40] sm:$0xff]  }
  0xff   :  { %935 = vmatprep.subr.bf16.mxu0 %v2039_v44  ;;  %v2051_v44 = vld [vmem:[#allocation10] sm:$0xff]   ;;  %1785 = vmatprep.subr.bf16.mxu1 %v2049_v42 }
 0x102   :  { %936 = vmatpush1.bf16.msra.mxu0 %v2037_v43  ;;  %v2050_v43 = vld [vmem:[#allocation13 + $0x40] sm:$0xff]  }
 0x103   :  { %937 = vmatprep.subr.bf16.mxu0 %v2042_v45  ;;  %v2052_v45 = vld [vmem:[#allocation13] sm:$0xff]  }
 0x106   :  { %938 = vmatpush1.bf16.msra.mxu0 %v2040_v46  ;;  %v2053_v46 = vld [vmem:[#allocation10 + $0x48] sm:$0xff]  }
 0x107   :  { %939 = vmatprep.subr.bf16.mxu0 %v2045_v47  ;;  %v2054_v47 = vld [vmem:[#allocation13 + $0x48] sm:$0xff]  }
 0x10a   :  { %940 = vmatpush1.bf16.msra.mxu0 %v2043_v48  ;;  %v2055_v48 = vld [vmem:[#allocation10 + $0x8] sm:$0xff]  }
 0x10b   :  { %941 = vmatprep.subr.bf16.mxu0 %v2048_v49  ;;  %v2056_v49 = vld [vmem:[#allocation13 + $0x8] sm:$0xff]  }
 0x10e   :  { %942 = vmatpush1.bf16.msra.mxu0 %v2046_v50  ;;  %v2057_v50 = vld [vmem:[#allocation10 + $0x50] sm:$0xff]  }
 0x10f   :  { %1816 = vmatprep.subr.bf16.mxu0 %v2050_v43 }
 0x1a4   :  { %v411_v23 = vpop.f32.mrb[0].mxu0 }
 0x1a5   :  { %v413_v26 = vpop.f32.mrb[1].mxu0  ;;  %v2589_v32 = vadd.f32 %v411_v23, %v200_v25 }
 0x1a6   :  { %v415_v27 = vpop.f32.mrb[2].mxu0  ;;  %v2585_v30 = vadd.f32 %v413_v26, %v204_v24 }
 0x1a7   :  { %v2583_v28 = vadd.f32 %v415_v27, %v200_v25  ;;  %v417_v29 = vpop.f32.mrb[3].mxu0 }
 0x1a8   :  { %v2587_v31 = vadd.f32 %v417_v29, %v204_v24 }
 0x1a9   :  { %v420_v34 = vpack.c.bf16 %v2583_v28, %v2589_v32 }
 0x1aa   :  { %v421_v33 = vpack.c.bf16 %v2587_v31, %v2585_v30 }
 0x1ac   :  { %658 = vmatprep.mubr.bf16.mxu1 %v421_v33 }
 0x1ad   :  { %659 = vmatmul.mubr.bf16.vlgmr.msra.gmra.mrb[0].mxu1 %v420_v34 }
 0x1ae   :  { %1786 = vmatpush3.bf16.msra.mxu1 %v2051_v44 }
 0x1af   :  { %1787 = vmatprep.subr.bf16.mxu1 %v2053_v46 }
 0x1b2   :  { %1788 = vmatpush3.bf16.msra.mxu1 %v2055_v48 }
 0x1b3   :  { %1789 = vmatprep.subr.bf16.mxu1 %v2057_v50 }
 0x280   :  { %v660_v54 = vpop.f32.mrb[0].mxu1 }
 0x281   :  { %v661_v55 = vadd.f32 %v660_v54, %v459_v52  ;;  %v662_v56 = vpop.f32.mrb[1].mxu1  ;;  %v2061_v54 = vld [vmem:[#allocation10 + $0x58] sm:$0xff]  }
 0x282   :  { %v663_v57 = vadd.f32 %v662_v56, %v463_v53  ;;  %v664_v58 = vpop.f32.mrb[2].mxu1  ;;  %v2063_v56 = vld [vmem:[#allocation10 + $0x18] sm:$0xff]  }
 0x283   :  { %v673_v59 = vmul.f32 %v661_v55, %v661_v55  ;;  %v665_v60 = vadd.f32 %v664_v58, %v459_v52  ;;  %v666_v61 = vpop.f32.mrb[3].mxu1  ;;  %v669_v26 = vmul.f32 0.5, %v661_v55  ;;  %v2059_v52 = vld [vmem:[#allocation10 + $0x10] sm:$0xff]   ;;  %v2065_v58 = vld [vmem:[#allocation10 + $0x60] sm:$0xff]  }
 0x284   :  { %v674_v62 = vmul.f32 %v663_v57, %v663_v57  ;;  %v667_v63 = vadd.f32 %v666_v61, %v463_v53  ;;  %v670_v33 = vmul.f32 0.5, %v663_v57  ;;  %v2060_v53 = vld [vmem:[#allocation13 + $0x10] sm:$0xff]   ;;  %1790 = vmatpush3.bf16.msra.mxu1 %v2059_v52  ;;  %v2068_v61 = vld [vmem:[#allocation13 + $0x20] sm:$0xff]  }
 0x285   :  { %v677_v0 = vmul.f32 %v673_v59, %v661_v55  ;;  %v675_v1 = vmul.f32 %v665_v60, %v665_v60  ;;  %v671_v27 = vmul.f32 0.5, %v665_v60  ;;  %1791 = vmatprep.subr.bf16.mxu1 %v2061_v54  ;;  %v2066_v59 = vld [vmem:[#allocation13 + $0x60] sm:$0xff]  }
 0x286   :  { %v678_v2 = vmul.f32 %v674_v62, %v663_v57  ;;  %v676_v3 = vmul.f32 %v667_v63, %v667_v63  ;;  %v672_v34 = vmul.f32 0.5, %v667_v63  ;;  %v2069_v62 = vld [vmem:[#allocation10 + $0x68] sm:$0xff]  }
 0x287   :  { %v681_v4 = vmul.f32 0.044715, %v677_v0  ;;  %v679_v5 = vmul.f32 %v675_v1, %v665_v60  ;;  %v2071_v0 = vld [vmem:[#allocation10 + $0x28] sm:$0xff]  }
 0x288   :  { %v682_v6 = vmul.f32 0.044715, %v678_v2  ;;  %v680_v7 = vmul.f32 %v676_v3, %v667_v63  ;;  %1792 = vmatpush3.bf16.msra.mxu1 %v2063_v56  ;;  %v2072_v1 = vld [vmem:[#allocation13 + $0x28] sm:$0xff]   ;;  %v2073_v2 = vld [vmem:[#allocation10 + $0x70] sm:$0xff]  }
 0x289   :  { %v685_v8 = vadd.f32 %v681_v4, %v661_v55  ;;  %v683_v9 = vmul.f32 0.044715, %v679_v5  ;;  %v2062_v55 = vld [vmem:[#allocation13 + $0x58] sm:$0xff]   ;;  %1793 = vmatprep.subr.bf16.mxu1 %v2065_v58  ;;  %v2074_v3 = vld [vmem:[#allocation13 + $0x70] sm:$0xff]  }
 0x28a   :  { %v686_v10 = vadd.f32 %v682_v6, %v663_v57  ;;  %v684_v11 = vmul.f32 0.044715, %v680_v7  ;;  %v2064_v57 = vld [vmem:[#allocation13 + $0x18] sm:$0xff]   ;;  %v2075_v4 = vld [vmem:[#allocation10 + $0x30] sm:$0xff]  }
 0x28b   :  { %v689_v12 = vmul.f32 0.7978846, %v685_v8  ;;  %v687_v13 = vadd.f32 %v683_v9, %v665_v60  ;;  %v2067_v60 = vld [vmem:[#allocation10 + $0x20] sm:$0xff]   ;;  %v2076_v5 = vld [vmem:[#allocation13 + $0x30] sm:$0xff]   ;;  %v2077_v6 = vld [vmem:[#allocation10 + $0x78] sm:$0xff]  }
 0x28c   :  { %v690_v14 = vmul.f32 0.7978846, %v686_v10  ;;  %v688_v15 = vadd.f32 %v684_v11, %v667_v63  ;;  %v2070_v63 = vld [vmem:[#allocation13 + $0x68] sm:$0xff]   ;;  %1794 = vmatpush3.bf16.msra.mxu1 %v2067_v60  ;;  %v2078_v7 = vld [vmem:[#allocation13 + $0x78] sm:$0xff]   ;;  %v739_v10 = vld [vmem:[%s2662_s6] sm:$0x3] }
 0x28d   :  { %2097 = vtanh.f32 %v689_v12  ;;  %v691_v16 = vmul.f32 0.7978846, %v687_v13  ;;  %1795 = vmatprep.subr.bf16.mxu1 %v2069_v62  ;;  %v2079_v8 = vld [vmem:[#allocation10 + $0x38] sm:$0xff]   ;;  %v744_v11 = vrot.slane %v739_v10, %v2579_v22  ;;  %v748_v12 = vrot.slane %v739_v10, %v2574_v20  ;;  %v1733_v10 = vld [vmem:[%s2664_s8] ss:$0 sm:$0xff] }
 0x28e   :  { %2099 = vtanh.f32 %v690_v14  ;;  %v692_v17 = vmul.f32 0.7978846, %v688_v15  ;;  %v2080_v9 = vld [vmem:[#allocation13 + $0x38] sm:$0xff]  }
 0x28f   :  { %2101 = vtanh.f32 %v691_v16 }
 0x290   :  { %2103 = vtanh.f32 %v692_v17  ;;  %1796 = vmatpush3.bf16.msra.mxu1 %v2071_v0  ;;  %v2343_v0 = vmov 0.0  }
 0x291   :  { %1797 = vmatprep.subr.bf16.mxu1 %v2073_v2  ;;  %v2083_v2 = vld [vmem:[#allocation11 + $0x10] sm:$0xff]  }
 0x294   :  { %1798 = vmatpush3.bf16.msra.mxu1 %v2075_v4  ;;  %v2085_v4 = vld [vmem:[#allocation11 + $0x20] sm:$0xff]  }
 0x295   :  { %1799 = vmatprep.subr.bf16.mxu1 %v2077_v6  ;;  %v2087_v6 = vld [vmem:[#allocation11 + $0x30] sm:$0xff]  }
 0x297   :  { %v2098_v18 = vpop.eup %2097 }
 0x298   :  { %v2100_v19 = vpop.eup %2099  ;;  %v697_v21 = vadd.f32 1.0, %v2098_v18  ;;  %1800 = vmatpush3.bf16.msra.mxu1 %v2079_v8 }
 0x299   :  { %v2102_v23 = vpop.eup %2101  ;;  %v698_v24 = vadd.f32 1.0, %v2100_v19  ;;  %1847 = vmatprep.subr.bf16.mxu1 %v2343_v0 }
 0x29a   :  { %v2104_v25 = vpop.eup %2103  ;;  %v699_v29 = vadd.f32 1.0, %v2102_v23  ;;  %v701_v36 = vmul.f32 %v697_v21, %v669_v26 }
 0x29b   :  { %v700_v35 = vadd.f32 1.0, %v2104_v25  ;;  %v702_v38 = vmul.f32 %v698_v24, %v670_v33 }
 0x29c   :  { %v703_v37 = vmul.f32 %v699_v29, %v671_v27 }
 0x29d   :  { %v704_v39 = vmul.f32 %v700_v35, %v672_v34 }
 0x29e   :  { %v705_v40 = vpack.c.bf16 %v703_v37, %v701_v36 }
 0x29f   :  { %v706_v41 = vpack.c.bf16 %v704_v39, %v702_v38 }
 0x2a1   :  { %943 = vmatprep.mubr.bf16.mxu0 %v706_v41 }
 0x2a2   :  { %944 = vmatmul.mubr.bf16.vlgmr.msra.gmra.mrb[4].mxu0 %v705_v40 }
 0x2a3   :  { %1817 = vmatpush3.bf16.msra.mxu0 %v2052_v45 }
 0x2a4   :  { %1818 = vmatprep.subr.bf16.mxu0 %v2054_v47 }
 0x2a7   :  { %1819 = vmatpush3.bf16.msra.mxu0 %v2056_v49 }
 0x2a8   :  { %1820 = vmatprep.subr.bf16.mxu0 %v2058_v51 }
 0x2ab   :  { %1821 = vmatpush3.bf16.msra.mxu0 %v2060_v53 }
 0x2ac   :  { %1822 = vmatprep.subr.bf16.mxu0 %v2062_v55 }
 0x2af   :  { %1823 = vmatpush3.bf16.msra.mxu0 %v2064_v57 }
 0x2b0   :  { %1824 = vmatprep.subr.bf16.mxu0 %v2066_v59 }
 0x2b3   :  { %1825 = vmatpush3.bf16.msra.mxu0 %v2068_v61 }
 0x2b4   :  { %1826 = vmatprep.subr.bf16.mxu0 %v2070_v63  ;;  %v2081_v63 = vld [vmem:[#allocation11] sm:$0xff]  }
 0x2b7   :  { %1827 = vmatpush3.bf16.msra.mxu0 %v2072_v1  ;;  %v2082_v1 = vld [vmem:[#allocation11 + $0x8] sm:$0xff]  }
 0x2b8   :  { %1828 = vmatprep.subr.bf16.mxu0 %v2074_v3  ;;  %v2084_v3 = vld [vmem:[#allocation11 + $0x18] sm:$0xff]  }
 0x2bb   :  { %1829 = vmatpush3.bf16.msra.mxu0 %v2076_v5  ;;  %v2086_v5 = vld [vmem:[#allocation11 + $0x28] sm:$0xff]  }
 0x2bc   :  { %1830 = vmatprep.subr.bf16.mxu0 %v2078_v7  ;;  %v2088_v7 = vld [vmem:[#allocation11 + $0x38] sm:$0xff]  }
 0x2bf   :  { %1831 = vmatpush3.bf16.msra.mxu0 %v2080_v9 }
 0x375   :  { %v945_v13 = vpop.f32.mrb[4].mxu0 }
 0x376   :  { %v946_v14 = vadd.f32 %v945_v13, %v744_v11  ;;  %v947_v15 = vpop.f32.mrb[5].mxu0 }
 0x377   :  { %v948_v16 = vadd.f32 %v947_v15, %v748_v12  ;;  %v949_v17 = vpop.f32.mrb[6].mxu0 }
 0x378   :  { %v954_v18 = vadd.f32 %v946_v14, %v2589_v32  ;;  %v950_v19 = vadd.f32 %v949_v17, %v744_v11  ;;  %v951_v21 = vpop.f32.mrb[7].mxu0 }
 0x379   :  { %v955_v23 = vadd.f32 %v948_v16, %v2585_v30  ;;  %v952_v24 = vadd.f32 %v951_v21, %v748_v12 }
 0x37a   :  { %v962_v25 = vmul.f32 %v954_v18, %v954_v18  ;;  %v956_v26 = vadd.f32 %v950_v19, %v2583_v28  ;;  %v958_v51 = vmul.f32 0.5, %v954_v18 }
 0x37b   :  { %v963_v27 = vmul.f32 %v955_v23, %v955_v23  ;;  %v957_v22 = vadd.f32 %v952_v24, %v2587_v31  ;;  %v959_v54 = vmul.f32 0.5, %v955_v23 }
 0x37c   :  { %v966_v29 = vmul.f32 %v962_v25, %v954_v18  ;;  %v964_v20 = vmul.f32 %v956_v26, %v956_v26  ;;  %v960_v52 = vmul.f32 0.5, %v956_v26 }
 0x37d   :  { %v967_v33 = vmul.f32 %v963_v27, %v955_v23  ;;  %v965_v34 = vmul.f32 %v957_v22, %v957_v22  ;;  %v961_v55 = vmul.f32 0.5, %v957_v22 }
 0x37e   :  { %v970_v35 = vmul.f32 0.044715, %v966_v29  ;;  %v968_v36 = vmul.f32 %v964_v20, %v956_v26 }
 0x37f   :  { %v971_v37 = vmul.f32 0.044715, %v967_v33  ;;  %v969_v38 = vmul.f32 %v965_v34, %v957_v22 }
 0x380   :  { %v974_v32 = vadd.f32 %v970_v35, %v954_v18  ;;  %v972_v39 = vmul.f32 0.044715, %v968_v36 }
 0x381   :  { %v975_v40 = vadd.f32 %v971_v37, %v955_v23  ;;  %v973_v41 = vmul.f32 0.044715, %v969_v38 }
 0x382   :  { %v978_v30 = vmul.f32 0.7978846, %v974_v32  ;;  %v976_v42 = vadd.f32 %v972_v39, %v956_v26 }
 0x383   :  { %v979_v43 = vmul.f32 0.7978846, %v975_v40  ;;  %v977_v44 = vadd.f32 %v973_v41, %v957_v22 }
 0x384   :  { %2105 = vtanh.f32 %v978_v30  ;;  %v980_v28 = vmul.f32 0.7978846, %v976_v42 }
 0x385   :  { %v981_v45 = vmul.f32 0.7978846, %v977_v44  ;;  %2107 = vtanh.f32 %v979_v43  ;;  %v2089_v44 = vld [vmem:[#allocation14] sm:$0xff]  }
 0x386   :  { %2109 = vtanh.f32 %v980_v28  ;;  %v2090_v28 = vld [vmem:[#allocation14 + $0x8] sm:$0xff]  }
 0x387   :  { %2111 = vtanh.f32 %v981_v45  ;;  %v2091_v45 = vld [vmem:[#allocation14 + $0x10] sm:$0xff]  }
 0x38e   :  { %v2106_v31 = vpop.eup %2105 }
 0x38f   :  { %v2108_v46 = vpop.eup %2107  ;;  %v986_v47 = vadd.f32 1.0, %v2106_v31  ;;  %v2092_v31 = vld [vmem:[#allocation14 + $0x18] sm:$0xff]  }
 0x390   :  { %v2110_v48 = vpop.eup %2109  ;;  %v987_v49 = vadd.f32 1.0, %v2108_v46  ;;  %v2093_v46 = vld [vmem:[#allocation14 + $0x20] sm:$0xff]  }
 0x391   :  { %v2112_v50 = vpop.eup %2111  ;;  %v988_v53 = vadd.f32 1.0, %v2110_v48  ;;  %v990_v57 = vmul.f32 %v986_v47, %v958_v51  ;;  %v2094_v47 = vld [vmem:[#allocation14 + $0x28] sm:$0xff]   ;;  %v2095_v48 = vld [vmem:[#allocation14 + $0x30] sm:$0xff]  }
 0x392   :  { %v989_v56 = vadd.f32 1.0, %v2112_v50  ;;  %v991_v59 = vmul.f32 %v987_v49, %v959_v54  ;;  %v2096_v49 = vld [vmem:[#allocation14 + $0x38] sm:$0xff]   ;;  %v1759_v50 = vld [vmem:[%s2668_s12] ss:$0 sm:$0xff] }
 0x393   :  { %v992_v58 = vmul.f32 %v988_v53, %v960_v52  ;;  %v1750_v51 = vld [vmem:[%s2666_s10] ss:$0 sm:$0xff] }
 0x394   :  { %v993_v60 = vmul.f32 %v989_v56, %v961_v55 }
 0x395   :  { %v994_v61 = vpack.c.bf16 %v992_v58, %v990_v57 }
 0x396   :  { %v995_v62 = vpack.c.bf16 %v993_v60, %v991_v59 }
 0x398   :  { %1163 = vmatprep.mubr.bf16.mxu1 %v995_v62  ;;  %1470 = vmatprep.mubr.bf16.mxu0 %v995_v62 }
 0x399   :  { %1164 = vmatmul.mubr.bf16.vlgmr.msra.gmra.mrb[4].mxu1 %v994_v61  ;;  %1471 = vmatmul.mubr.bf16.vlgmr.msra.gmra.mrb[8].mxu0 %v994_v61 }
 0x39a   :  { %1848 = vmatpush3.bf16.msra.mxu1 %v2081_v63  ;;  %1863 = vmatprep.mubr.msk.bf16.mxu1 %vm2344_vm0, %v2343_v0 }
 0x39b   :  { %1849 = vmatprep.subr.bf16.mxu1 %v2343_v0 }
 0x39e   :  { %1850 = vmatpush3.bf16.msra.mxu1 %v2082_v1 }
 0x39f   :  { %1851 = vmatprep.subr.bf16.mxu1 %v2343_v0 }
 0x3a2   :  { %1852 = vmatpush3.bf16.msra.mxu1 %v2083_v2 }
 0x3a3   :  { %1853 = vmatprep.subr.bf16.mxu1 %v2343_v0 }
 0x3a6   :  { %1854 = vmatpush3.bf16.msra.mxu1 %v2084_v3 }
 0x3a7   :  { %1855 = vmatprep.subr.bf16.mxu1 %v2343_v0 }
 0x3aa   :  { %1856 = vmatpush3.bf16.msra.mxu1 %v2085_v4 }
 0x3ab   :  { %1857 = vmatprep.subr.bf16.mxu1 %v2343_v0 }
 0x3ae   :  { %1858 = vmatpush3.bf16.msra.mxu1 %v2086_v5 }
 0x3af   :  { %1859 = vmatprep.subr.bf16.mxu1 %v2343_v0 }
 0x3b2   :  { %1860 = vmatpush3.bf16.msra.mxu1 %v2087_v6 }
 0x3b3   :  { %1861 = vmatprep.subr.bf16.mxu1 %v2343_v0 }
 0x3b6   :  { %1862 = vmatpush3.bf16.msra.mxu1 %v2088_v7 }
 0x3b7   :  { %1867 = vmatprep.subr.bf16.mxu1 %v2343_v0 }
 0x46c   :  { %v1801_v8 = vpop.f32.mrb[4].mxu1  ;;  %v1832_v9 = vpop.f32.mrb[8].mxu0 }
 0x46d   :  { %v1802_v11 = vpop.f32.mrb[5].mxu1  ;;  %v1833_v12 = vpop.f32.mrb[9].mxu0 }
 0x46e   :  { %v1803_v13 = vadd.f32 %v1802_v11, %v1801_v8  ;;  %v1834_v14 = vadd.f32 %v1833_v12, %v1832_v9  ;;  %v1804_v15 = vpop.f32.mrb[6].mxu1  ;;  %v1835_v16 = vpop.f32.mrb[10].mxu0 }
 0x46f   :  { %v1805_v17 = vpop.f32.mrb[7].mxu1  ;;  %v1836_v18 = vpop.f32.mrb[11].mxu0 }
 0x470   :  { %v1166_v19 = vadd.f32 %v1803_v13, %v1733_v10  ;;  %v1806_v21 = vadd.f32 %v1805_v17, %v1804_v15  ;;  %v1837_v23 = vadd.f32 %v1836_v18, %v1835_v16  ;;  %v1473_v53 = vadd.f32 %v1834_v14, %v1759_v50  ;;  %v1776_v17 = vld [vmem:[%s2670_s14] ss:$0 sm:$0xff] }
 0x472   :  { %v1174_v24 = vmul.f32 %v1166_v19, %v1166_v19  ;;  %v1169_v25 = vadd.f32 %v1806_v21, %v1733_v10  ;;  %v1172_v39 = vmul.f32 0.5, %v1166_v19  ;;  %v1476_v57 = vadd.f32 %v1837_v23, %v1759_v50 }
 0x474   :  { %v1176_v26 = vmul.f32 %v1174_v24, %v1166_v19  ;;  %v1175_v27 = vmul.f32 %v1169_v25, %v1169_v25  ;;  %v1173_v40 = vmul.f32 0.5, %v1169_v25 }
 0x476   :  { %v1178_v22 = vmul.f32 0.044715, %v1176_v26  ;;  %v1177_v29 = vmul.f32 %v1175_v27, %v1169_v25 }
 0x478   :  { %v1180_v20 = vadd.f32 %v1178_v22, %v1166_v19  ;;  %v1179_v33 = vmul.f32 0.044715, %v1177_v29 }
 0x47a   :  { %v1182_v34 = vmul.f32 0.7978846, %v1180_v20  ;;  %v1181_v35 = vadd.f32 %v1179_v33, %v1169_v25 }
 0x47c   :  { %2113 = vtanh.f32 %v1182_v34  ;;  %v1183_v36 = vmul.f32 0.7978846, %v1181_v35 }
 0x47e   :  { %2115 = vtanh.f32 %v1183_v36 }
 0x486   :  { %v2114_v37 = vpop.eup %2113 }
 0x487   :  { %v1186_v38 = vadd.f32 1.0, %v2114_v37 }
 0x488   :  { %v2116_v32 = vpop.eup %2115 }
 0x489   :  { %v1187_v41 = vadd.f32 1.0, %v2116_v32  ;;  %v1188_v30 = vmul.f32 %v1186_v38, %v1172_v39 }
 0x48b   :  { %v1189_v42 = vmul.f32 %v1187_v41, %v1173_v40 }
 0x48d   :  { %v1190_v43 = vpack.c.bf16 %v1189_v42, %v1188_v30 }
 0x48f   :  { %1864 = vmatmul.mubr.bf16.vlgmr.msra.gmra.mrb[8].mxu1 %v1190_v43 }
 0x490   :  { %1883 = vmatprep.mubr.msk.bf16.mxu1 %vm2344_vm0, %v2343_v0  ;;  %1868 = vmatpush3.bf16.msra.mxu1 %v2089_v44 }
 0x491   :  { %1869 = vmatprep.subr.bf16.mxu1 %v2343_v0 }
 0x494   :  { %1870 = vmatpush3.bf16.msra.mxu1 %v2090_v28 }
 0x495   :  { %1871 = vmatprep.subr.bf16.mxu1 %v2343_v0 }
 0x498   :  { %1872 = vmatpush3.bf16.msra.mxu1 %v2091_v45 }
 0x499   :  { %1873 = vmatprep.subr.bf16.mxu1 %v2343_v0 }
 0x49c   :  { %1874 = vmatpush3.bf16.msra.mxu1 %v2092_v31 }
 0x49d   :  { %1875 = vmatprep.subr.bf16.mxu1 %v2343_v0 }
 0x4a0   :  { %1876 = vmatpush3.bf16.msra.mxu1 %v2093_v46 }
 0x4a1   :  { %1877 = vmatprep.subr.bf16.mxu1 %v2343_v0 }
 0x4a4   :  { %1878 = vmatpush3.bf16.msra.mxu1 %v2094_v47 }
 0x4a5   :  { %1879 = vmatprep.subr.bf16.mxu1 %v2343_v0 }
 0x4a8   :  { %1880 = vmatpush3.bf16.msra.mxu1 %v2095_v48 }
 0x4a9   :  { %1881 = vmatprep.subr.bf16.mxu1 %v2343_v0 }
 0x4ac   :  { %1882 = vmatpush3.bf16.msra.mxu1 %v2096_v49 }
 0x562   :  { %v1296_v52 = vpop.f32.mrb[8].mxu1 }
 0x563   :  { %v1297_v54 = vadd.f32 %v1750_v51, %v1296_v52  ;;  %v1865_v55 = vpop.f32.mrb[9].mxu1 }
 0x564   :  { %v1299_v56 = vpop.f32.mrb[10].mxu1 }
 0x565   :  { %v1479_v58 = vadd.f32 %v1473_v53, %v1297_v54  ;;  %v1300_v59 = vadd.f32 %v1750_v51, %v1299_v56  ;;  %v1866_v60 = vpop.f32.mrb[11].mxu1 }
 0x567   :  { %v1483_v61 = vmul.f32 %v1479_v58, %v1479_v58  ;;  %v1480_v62 = vadd.f32 %v1476_v57, %v1300_v59  ;;  %v1481_v11 = vmul.f32 0.5, %v1479_v58 }
 0x569   :  { %v1485_v63 = vmul.f32 %v1483_v61, %v1479_v58  ;;  %v1484_v0 = vmul.f32 %v1480_v62, %v1480_v62  ;;  %v1482_v12 = vmul.f32 0.5, %v1480_v62 }
 0x56b   :  { %v1487_v1 = vmul.f32 0.044715, %v1485_v63  ;;  %v1486_v2 = vmul.f32 %v1484_v0, %v1480_v62 }
 0x56d   :  { %v1489_v3 = vadd.f32 %v1487_v1, %v1479_v58  ;;  %v1488_v4 = vmul.f32 0.044715, %v1486_v2 }
 0x56f   :  { %v1491_v5 = vmul.f32 0.7978846, %v1489_v3  ;;  %v1490_v6 = vadd.f32 %v1488_v4, %v1480_v62 }
 0x571   :  { %2117 = vtanh.f32 %v1491_v5  ;;  %v1492_v7 = vmul.f32 0.7978846, %v1490_v6 }
 0x573   :  { %2119 = vtanh.f32 %v1492_v7 }
 0x57b   :  { %v2118_v8 = vpop.eup %2117 }
 0x57c   :  { %v1495_v9 = vadd.f32 1.0, %v2118_v8 }
 0x57d   :  { %v2120_v10 = vpop.eup %2119 }
 0x57e   :  { %v1496_v13 = vadd.f32 1.0, %v2120_v10  ;;  %v1497_v14 = vmul.f32 %v1495_v9, %v1481_v11 }
 0x580   :  { %v1498_v15 = vmul.f32 %v1496_v13, %v1482_v12 }
 0x582   :  { %v1499_v16 = vpack.c.bf16 %v1498_v15, %v1497_v14 }
 0x584   :  { %1884 = vmatmul.mubr.bf16.vlgmr.msra.gmra.mrb[12].mxu1 %v1499_v16 }
 0x657   :  { %v1605_v18 = vpop.f32.mrb[12].mxu1 }
 0x658   :  { %v1606_v19 = vadd.f32 %v1776_v17, %v1605_v18  ;;  %v1885_v21 = vpop.f32.mrb[13].mxu1 }
 0x659   :  { %v1608_v23 = vpop.f32.mrb[14].mxu1 }
 0x65a   :  { %1612 = vst [vmem:[#allocation16] sm:$0xff] %v1606_v19  ;;  %v1609_v24 = vadd.f32 %v1776_v17, %v1608_v23  ;;  %v1886_v25 = vpop.f32.mrb[15].mxu1 }
 0x65c   :  { %1613 = vst [vmem:[#allocation16 + $0x8] sm:$0xff] %v1609_v24 }
 0x65d   :  { %2308 = shalt.err (!%p2305_p12)
}
 0x65e   :  { %s2309_s3 = scalar_lea.hbm %s2671_s15, 256 }
 0x65f   :  { %p2310_p13 = scmp.ne.s32.totalorder %s2671_s15, %s2309_s3  ;;  %p2313_p0 = scmp.lt.u32.totalorder %s2309_s3, %s2671_s15 }
 0x661   :  { %p2315_p1 = pnand %p2313_p0, %p2310_p13 }
 0x663   :  { %2318 = shalt.err (!%p2315_p1)
}
 0x664   :  { %1625 = dma.vmem_to_hbm [thread:$0]  %s1620_s18, 256, %s2671_s15, [#allocation4], %s2333_s30, %s2333_s30, %s2334_s16  }
 0x665   :  { %2329 = dma.done.wait [#allocation4], 256  }
 0x666   :  { %2330 = vsyncadd [#allocation4], 4294967040 }
 0x667   :  { %1629 = vsyncpa [#allocation3], 1 }
 0x668   :  { %1630 = vsyncpa [#allocation6], 1 }
 0x669   :  { %1631 = vsyncpa [#allocation9], 1 }
 0x66a   :  { %1632 = vsyncpa [#allocation12], 1 }
 0x66b   :  { %1633 = vsyncpa [#allocation15], 1 }
 0x66c   :  { %1634 = vsyncpa [#allocation4], 1 }

</bundles_post_ra>
